<compile_context>
chip_gen: v7x
topology: tpu7x:2x2x1
jax: 0.10.0
libtpu: 0.0.40
codegen_flags: <defaults>
</compile_context>

<pallas_src>
import jax
import jax.numpy as jnp
from jax import lax
from jax.experimental import pallas as pl
from jax.experimental.pallas import tpu as pltpu
import numpy as np

T, B, D, H = 8, 2, 120, 120   # seq_len, batch, input_size (module fixes 120), hidden
DP = 128                      # padded input size  (lane-aligned)
HP = 128                      # padded hidden size (lane-aligned); 4*HP = 512
OP = 128                      # padded fc3 output lanes (real output is column 0)


def lstm_mlp_kernel(x_ref, wih_t_ref, whh_t_ref, b_gate_ref,
                    w1t_ref, b1_ref, w2t_ref, b2_ref, w3t_ref, b3_ref,
                    out_ref, outs_ref, ig_ref):
    """LSTM recurrence (last batch row only) + 3-layer MLP head, fully VMEM-resident.

    x_ref      : (T, DP)     bf16  -- x[:, B-1, :] zero-padded to 128 lanes
    wih_t_ref  : (DP, 4*HP)  bf16  -- W_ih^T, gate blocks (i,f,g,o) each padded to 128
    whh_t_ref  : (HP, 4*HP)  bf16  -- W_hh^T, same gate packing
    b_gate_ref : (1, 4*HP)   f32   -- b_ih + b_hh, same gate packing
    w1t/w2t    : (HP, HP)    bf16,  b1/b2 : (1, HP) f32
    w3t        : (HP, OP)    bf16,  b3    : (1, OP) f32  (real column = 0)
    out_ref    : (T, OP)     f32   -- lane-dense output, column 0 is the result
    outs_ref   : (T, HP)     f32 scratch -- per-timestep hidden state
    ig_ref     : (T, 4*HP)   f32 scratch -- hoisted input projection
    """
    Tn = x_ref.shape[0]
    Hn = whh_t_ref.shape[0]                               # = HP

    # Hoisted input projection: one matmul instead of T serial ones on the critical path.
    ig_ref[...] = (jnp.dot(x_ref[...], wih_t_ref[...],
                           preferred_element_type=jnp.float32)
                   + b_gate_ref[...])                     # (T, 4*HP) f32

    def step(t, carry):
        h, c = carry                                      # (1, HP) f32
        gates = ig_ref[pl.ds(t, 1), :] + jnp.dot(
            h.astype(jnp.bfloat16), whh_t_ref[...],
            preferred_element_type=jnp.float32)           # (1, 4*HP) f32
        # 128-aligned gate slices -> free vreg selects (PyTorch gate order i, f, g, o).
        i_g = jax.nn.sigmoid(gates[:, 0 * Hn:1 * Hn])
        f_g = jax.nn.sigmoid(gates[:, 1 * Hn:2 * Hn])
        g_g = jnp.tanh(gates[:, 2 * Hn:3 * Hn])
        o_g = jax.nn.sigmoid(gates[:, 3 * Hn:4 * Hn])
        c_new = f_g * c + i_g * g_g
        h_new = o_g * jnp.tanh(c_new)
        outs_ref[pl.ds(t, 1), :] = h_new                  # lane-dense (1, 128) store
        return (h_new, c_new)

    h0 = jnp.zeros((1, Hn), jnp.float32)
    c0 = jnp.zeros((1, Hn), jnp.float32)
    lax.fori_loop(0, Tn, step, (h0, c0), unroll=True)     # T=8 static -> full unroll

    # MLP head: fc1 -> relu -> fc2 -> relu -> fc3 (bf16 MXU operands, f32 accumulation).
    y = outs_ref[...].astype(jnp.bfloat16)                # (T, HP)
    h1 = jnp.maximum(
        jnp.dot(y, w1t_ref[...], preferred_element_type=jnp.float32) + b1_ref[...], 0.0)
    h2 = jnp.maximum(
        jnp.dot(h1.astype(jnp.bfloat16), w2t_ref[...],
                preferred_element_type=jnp.float32) + b2_ref[...], 0.0)
    out_ref[...] = (jnp.dot(h2.astype(jnp.bfloat16), w3t_ref[...],
                            preferred_element_type=jnp.float32) + b3_ref[...])


def _pack_gate_matrix(w_t, rows_real, rows_pad):
    """(rows_real, 4*H) -> (rows_pad, 4*HP), each gate block zero-padded to 128 lanes."""
    out = jnp.zeros((rows_pad, 4 * HP), jnp.float32)
    for g in range(4):
        out = out.at[:rows_real, g * HP:g * HP + H].set(w_t[:, g * H:(g + 1) * H])
    return out


def _pack_gate_vector(b):
    out = jnp.zeros((1, 4 * HP), jnp.float32)
    for g in range(4):
        out = out.at[0, g * HP:g * HP + H].set(b[g * H:(g + 1) * H])
    return out


@jax.jit
def lstm_classifier_forward(x, params):
    (wih, whh, bih, bhh, w1, b1, w2, b2, w3, b3) = params

    # ---- one-time parameter repacking (plain-JAX glue) ----
    wih_p = _pack_gate_matrix(wih.T, D, DP).astype(jnp.bfloat16)   # (DP, 4*HP)
    whh_p = _pack_gate_matrix(whh.T, H, HP).astype(jnp.bfloat16)   # (HP, 4*HP)
    bg_p = _pack_gate_vector(bih + bhh)                            # (1, 4*HP) f32

    w1_p = jnp.zeros((HP, HP), jnp.float32).at[:H, :H].set(w1.T).astype(jnp.bfloat16)
    w2_p = jnp.zeros((HP, HP), jnp.float32).at[:H, :H].set(w2.T).astype(jnp.bfloat16)
    w3_p = jnp.zeros((HP, OP), jnp.float32).at[:H, :1].set(w3.T).astype(jnp.bfloat16)
    b1_p = jnp.zeros((1, HP), jnp.float32).at[0, :H].set(b1)
    b2_p = jnp.zeros((1, HP), jnp.float32).at[0, :H].set(b2)
    b3_p = jnp.zeros((1, OP), jnp.float32).at[0, :1].set(b3)

    # Only the last batch row feeds the head (torch `out[:, -1, :]`); rows are independent,
    # so only that row's recurrence is computed. Zero-pad D -> 128.
    x_last = (jnp.zeros((T, DP), jnp.float32)
              .at[:, :D].set(x[:, B - 1, :])
              .astype(jnp.bfloat16))

    out_p = pl.pallas_call(
        lstm_mlp_kernel,
        out_shape=jax.ShapeDtypeStruct((T, OP), jnp.float32),
        in_specs=[pl.BlockSpec(memory_space=pltpu.MemorySpace.VMEM)] * 10,
        out_specs=pl.BlockSpec(memory_space=pltpu.MemorySpace.VMEM),
        scratch_shapes=[pltpu.VMEM((T, HP), jnp.float32),        # per-step hidden states
                        pltpu.VMEM((T, 4 * HP), jnp.float32)],   # hoisted input projection
        cost_estimate=pl.CostEstimate(flops=3_000_000,
                                      transcendentals=5_120,
                                      bytes_accessed=400_000),
    )(x_last, wih_p, whh_p, bg_p, w1_p, b1_p, w2_p, b2_p, w3_p, b3_p)

    return out_p[:, :1]                                           # (T, 1)


def reference_forward(x, params):
    """Pure-JAX (f32) reference reproducing PyTorch LSTMClassifier.forward."""
    (wih, whh, bih, bhh, w1, b1, w2, b2, w3, b3) = params
    h = jnp.zeros((B, H), jnp.float32)
    c = jnp.zeros((B, H), jnp.float32)
    outs = []
    for t in range(T):
        gates = x[t] @ wih.T + bih + h @ whh.T + bhh
        i_g = jax.nn.sigmoid(gates[:, 0 * H:1 * H])
        f_g = jax.nn.sigmoid(gates[:, 1 * H:2 * H])
        g_g = jnp.tanh(gates[:, 2 * H:3 * H])
        o_g = jax.nn.sigmoid(gates[:, 3 * H:4 * H])
        c = f_g * c + i_g * g_g
        h = o_g * jnp.tanh(c)
        outs.append(h)
    out = jnp.stack(outs, axis=0)              # (T, B, H)
    y = out[:, -1, :]                          # (T, H)  <- last batch element, all steps
    y = jnp.maximum(y @ w1.T + b1, 0.0)
    y = jnp.maximum(y @ w2.T + b2, 0.0)
    return y @ w3.T + b3                       # (T, 1)


def init_params(key):
    """Deterministic synthetic params with PyTorch-like shapes & init scale."""
    ks = jax.random.split(key, 10)
    klstm = 1.0 / np.sqrt(H)

    def u(k, shape, bound):
        return jax.random.uniform(k, shape, jnp.float32, -bound, bound)

    wih = u(ks[0], (4 * H, D), klstm)
    whh = u(ks[1], (4 * H, H), klstm)
    bih = u(ks[2], (4 * H,), klstm)
    bhh = u(ks[3], (4 * H,), klstm)
    kfc = 1.0 / np.sqrt(H)
    w1 = u(ks[4], (H, H), kfc)
    b1 = u(ks[5], (H,), kfc)
    w2 = u(ks[6], (H, H), kfc)
    b2 = u(ks[7], (H,), kfc)
    w3 = u(ks[8], (1, H), kfc)
    b3 = u(ks[9], (1,), kfc)
    return (wih, whh, bih, bhh, w1, b1, w2, b2, w3, b3)


if __name__ == "__main__":
    key = jax.random.PRNGKey(0)
    kx, kp = jax.random.split(key)
    x = jax.random.normal(kx, (T, B, D), jnp.float32)
    params = init_params(kp)

    out = lstm_classifier_forward(x, params)
    out = jax.block_until_ready(out)

    ref = jax.block_until_ready(reference_forward(x, params))
    # Tolerance accounts for bf16 MXU operands (f32 accumulation) vs. pure-f32 reference.
    np.testing.assert_allclose(np.asarray(out), np.asarray(ref),
                               rtol=1e-2, atol=1e-2)
    print("KERNEL_OK")
</pallas_src>

<mosaic_0001>
module attributes {stable_mosaic.version = 11 : i64} {
  func.func @lstm_mlp_kernel(%arg0: memref<8x128xbf16, #tpu.memory_space<vmem>>, %arg1: memref<128x512xbf16, #tpu.memory_space<vmem>>, %arg2: memref<128x512xbf16, #tpu.memory_space<vmem>>, %arg3: memref<1x512xf32, #tpu.memory_space<vmem>>, %arg4: memref<128x128xbf16, #tpu.memory_space<vmem>>, %arg5: memref<1x128xf32, #tpu.memory_space<vmem>>, %arg6: memref<128x128xbf16, #tpu.memory_space<vmem>>, %arg7: memref<1x128xf32, #tpu.memory_space<vmem>>, %arg8: memref<128x128xbf16, #tpu.memory_space<vmem>>, %arg9: memref<1x128xf32, #tpu.memory_space<vmem>>, %arg10: memref<8x128xf32, #tpu.memory_space<vmem>>, %arg11: memref<8x128xf32, #tpu.memory_space<vmem>>, %arg12: memref<8x512xf32, #tpu.memory_space<vmem>>) attributes {dimension_semantics = [], scalar_prefetch = 0 : i64, scratch_operands = 2 : i64, tpu.core_type = #tpu.core_type<tc>} {
    %c0 = arith.constant 0 : index
    %c0_0 = arith.constant 0 : index
    %0 = vector.load %arg0[%c0, %c0_0] : memref<8x128xbf16, #tpu.memory_space<vmem>>, vector<8x128xbf16>
    %c0_1 = arith.constant 0 : index
    %c0_2 = arith.constant 0 : index
    %1 = vector.load %arg1[%c0_1, %c0_2] : memref<128x512xbf16, #tpu.memory_space<vmem>>, vector<128x512xbf16>
    %cst = arith.constant dense<0.000000e+00> : vector<8x512xf32>
    %2 = tpu.matmul %0, %1, %cst {dimension_numbers = #tpu.dot_dimension_numbers<[1], [0], [0], [1], [0, 0, 1, 1], [], []>} : vector<8x128xbf16>, vector<128x512xbf16>, vector<8x512xf32> -> vector<8x512xf32>
    %c0_3 = arith.constant 0 : index
    %c0_4 = arith.constant 0 : index
    %3 = vector.load %arg3[%c0_3, %c0_4] : memref<1x512xf32, #tpu.memory_space<vmem>>, vector<1x512xf32>
    %4 = vector.broadcast %3 : vector<1x512xf32> to vector<8x512xf32>
    %5 = arith.addf %2, %4 : vector<8x512xf32>
    %c0_5 = arith.constant 0 : index
    %c0_6 = arith.constant 0 : index
    %6 = vector.load %arg12[%c0_5, %c0_6] : memref<8x512xf32, #tpu.memory_space<vmem>>, vector<8x512xf32>
    tpu.vector_store %arg12[%c0_5, %c0_6], %5 {strides = array<i32>} : memref<8x512xf32, #tpu.memory_space<vmem>>, vector<8x512xf32>,
    %cst_7 = arith.constant 0.000000e+00 : f32
    %7 = vector.broadcast %cst_7 : f32 to vector<1x128xf32>
    %cst_8 = arith.constant 0.000000e+00 : f32
    %8 = vector.broadcast %cst_8 : f32 to vector<1x128xf32>
    %c0_i32 = arith.constant 0 : i32
    %9 = arith.index_cast %c0_i32 : i32 to index
    %c0_9 = arith.constant 0 : index
    %10 = vector.load %arg12[%9, %c0_9] : memref<8x512xf32, #tpu.memory_space<vmem>>, vector<1x512xf32>
    %11 = arith.truncf %7 : vector<1x128xf32> to vector<1x128xbf16>
    %c0_10 = arith.constant 0 : index
    %c0_11 = arith.constant 0 : index
    %12 = vector.load %arg2[%c0_10, %c0_11] : memref<128x512xbf16, #tpu.memory_space<vmem>>, vector<128x512xbf16>
    %cst_12 = arith.constant dense<0.000000e+00> : vector<1x512xf32>
    %13 = tpu.matmul %11, %12, %cst_12 {dimension_numbers = #tpu.dot_dimension_numbers<[1], [0], [0], [1], [0, 0, 1, 1], [], []>} : vector<1x128xbf16>, vector<128x512xbf16>, vector<1x512xf32> -> vector<1x512xf32>
    %14 = arith.addf %10, %13 : vector<1x512xf32>
    %15 = vector.extract_strided_slice %14 {offsets = [0, 0], sizes = [1, 128], strides = [1, 1]} : vector<1x512xf32> to vector<1x128xf32>
    %16 = arith.negf %15 : vector<1x128xf32>
    %17 = math.exp %16 : vector<1x128xf32>
    %cst_13 = arith.constant 1.000000e+00 : f32
    %18 = vector.broadcast %cst_13 : f32 to vector<1x128xf32>
    %19 = arith.addf %18, %17 : vector<1x128xf32>
    %20 = arith.divf %18, %19 : vector<1x128xf32>
    %21 = vector.extract_strided_slice %14 {offsets = [0, 128], sizes = [1, 128], strides = [1, 1]} : vector<1x512xf32> to vector<1x128xf32>
    %22 = arith.negf %21 : vector<1x128xf32>
    %23 = math.exp %22 : vector<1x128xf32>
    %cst_14 = arith.constant 1.000000e+00 : f32
    %24 = vector.broadcast %cst_14 : f32 to vector<1x128xf32>
    %25 = arith.addf %24, %23 : vector<1x128xf32>
    %26 = arith.divf %24, %25 : vector<1x128xf32>
    %27 = vector.extract_strided_slice %14 {offsets = [0, 256], sizes = [1, 128], strides = [1, 1]} : vector<1x512xf32> to vector<1x128xf32>
    %28 = math.tanh %27 : vector<1x128xf32>
    %29 = vector.extract_strided_slice %14 {offsets = [0, 384], sizes = [1, 128], strides = [1, 1]} : vector<1x512xf32> to vector<1x128xf32>
    %30 = arith.negf %29 : vector<1x128xf32>
    %31 = math.exp %30 : vector<1x128xf32>
    %cst_15 = arith.constant 1.000000e+00 : f32
    %32 = vector.broadcast %cst_15 : f32 to vector<1x128xf32>
    %33 = arith.addf %32, %31 : vector<1x128xf32>
    %34 = arith.divf %32, %33 : vector<1x128xf32>
    %35 = arith.mulf %26, %8 : vector<1x128xf32>
    %36 = arith.mulf %20, %28 : vector<1x128xf32>
    %37 = arith.addf %35, %36 : vector<1x128xf32>
    %38 = math.tanh %37 : vector<1x128xf32>
    %39 = arith.mulf %34, %38 : vector<1x128xf32>
    %40 = arith.index_cast %c0_i32 : i32 to index
    %c0_16 = arith.constant 0 : index
    %41 = vector.load %arg11[%40, %c0_16] : memref<8x128xf32, #tpu.memory_space<vmem>>, vector<1x128xf32>
    tpu.vector_store %arg11[%40, %c0_16], %39 {strides = array<i32>} : memref<8x128xf32, #tpu.memory_space<vmem>>, vector<1x128xf32>,
    %c1_i32 = arith.constant 1 : i32
    %42 = arith.index_cast %c1_i32 : i32 to index
    %c0_17 = arith.constant 0 : index
    %43 = vector.load %arg12[%42, %c0_17] : memref<8x512xf32, #tpu.memory_space<vmem>>, vector<1x512xf32>
    %44 = arith.truncf %39 : vector<1x128xf32> to vector<1x128xbf16>
    %c0_18 = arith.constant 0 : index
    %c0_19 = arith.constant 0 : index
    %45 = vector.load %arg2[%c0_18, %c0_19] : memref<128x512xbf16, #tpu.memory_space<vmem>>, vector<128x512xbf16>
    %cst_20 = arith.constant dense<0.000000e+00> : vector<1x512xf32>
    %46 = tpu.matmul %44, %45, %cst_20 {dimension_numbers = #tpu.dot_dimension_numbers<[1], [0], [0], [1], [0, 0, 1, 1], [], []>} : vector<1x128xbf16>, vector<128x512xbf16>, vector<1x512xf32> -> vector<1x512xf32>
    %47 = arith.addf %43, %46 : vector<1x512xf32>
    %48 = vector.extract_strided_slice %47 {offsets = [0, 0], sizes = [1, 128], strides = [1, 1]} : vector<1x512xf32> to vector<1x128xf32>
    %49 = arith.negf %48 : vector<1x128xf32>
    %50 = math.exp %49 : vector<1x128xf32>
    %cst_21 = arith.constant 1.000000e+00 : f32
    %51 = vector.broadcast %cst_21 : f32 to vector<1x128xf32>
    %52 = arith.addf %51, %50 : vector<1x128xf32>
    %53 = arith.divf %51, %52 : vector<1x128xf32>
    %54 = vector.extract_strided_slice %47 {offsets = [0, 128], sizes = [1, 128], strides = [1, 1]} : vector<1x512xf32> to vector<1x128xf32>
    %55 = arith.negf %54 : vector<1x128xf32>
    %56 = math.exp %55 : vector<1x128xf32>
    %cst_22 = arith.constant 1.000000e+00 : f32
    %57 = vector.broadcast %cst_22 : f32 to vector<1x128xf32>
    %58 = arith.addf %57, %56 : vector<1x128xf32>
    %59 = arith.divf %57, %58 : vector<1x128xf32>
    %60 = vector.extract_strided_slice %47 {offsets = [0, 256], sizes = [1, 128], strides = [1, 1]} : vector<1x512xf32> to vector<1x128xf32>
    %61 = math.tanh %60 : vector<1x128xf32>
    %62 = vector.extract_strided_slice %47 {offsets = [0, 384], sizes = [1, 128], strides = [1, 1]} : vector<1x512xf32> to vector<1x128xf32>
    %63 = arith.negf %62 : vector<1x128xf32>
    %64 = math.exp %63 : vector<1x128xf32>
    %cst_23 = arith.constant 1.000000e+00 : f32
    %65 = vector.broadcast %cst_23 : f32 to vector<1x128xf32>
    %66 = arith.addf %65, %64 : vector<1x128xf32>
    %67 = arith.divf %65, %66 : vector<1x128xf32>
    %68 = arith.mulf %59, %37 : vector<1x128xf32>
    %69 = arith.mulf %53, %61 : vector<1x128xf32>
    %70 = arith.addf %68, %69 : vector<1x128xf32>
    %71 = math.tanh %70 : vector<1x128xf32>
    %72 = arith.mulf %67, %71 : vector<1x128xf32>
    %73 = arith.index_cast %c1_i32 : i32 to index
    %c0_24 = arith.constant 0 : index
    %74 = vector.load %arg11[%73, %c0_24] : memref<8x128xf32, #tpu.memory_space<vmem>>, vector<1x128xf32>
    tpu.vector_store %arg11[%73, %c0_24], %72 {strides = array<i32>} : memref<8x128xf32, #tpu.memory_space<vmem>>, vector<1x128xf32>,
    %c2_i32 = arith.constant 2 : i32
    %75 = arith.index_cast %c2_i32 : i32 to index
    %c0_25 = arith.constant 0 : index
    %76 = vector.load %arg12[%75, %c0_25] : memref<8x512xf32, #tpu.memory_space<vmem>>, vector<1x512xf32>
    %77 = arith.truncf %72 : vector<1x128xf32> to vector<1x128xbf16>
    %c0_26 = arith.constant 0 : index
    %c0_27 = arith.constant 0 : index
    %78 = vector.load %arg2[%c0_26, %c0_27] : memref<128x512xbf16, #tpu.memory_space<vmem>>, vector<128x512xbf16>
    %cst_28 = arith.constant dense<0.000000e+00> : vector<1x512xf32>
    %79 = tpu.matmul %77, %78, %cst_28 {dimension_numbers = #tpu.dot_dimension_numbers<[1], [0], [0], [1], [0, 0, 1, 1], [], []>} : vector<1x128xbf16>, vector<128x512xbf16>, vector<1x512xf32> -> vector<1x512xf32>
    %80 = arith.addf %76, %79 : vector<1x512xf32>
    %81 = vector.extract_strided_slice %80 {offsets = [0, 0], sizes = [1, 128], strides = [1, 1]} : vector<1x512xf32> to vector<1x128xf32>
    %82 = arith.negf %81 : vector<1x128xf32>
    %83 = math.exp %82 : vector<1x128xf32>
    %cst_29 = arith.constant 1.000000e+00 : f32
    %84 = vector.broadcast %cst_29 : f32 to vector<1x128xf32>
    %85 = arith.addf %84, %83 : vector<1x128xf32>
    %86 = arith.divf %84, %85 : vector<1x128xf32>
    %87 = vector.extract_strided_slice %80 {offsets = [0, 128], sizes = [1, 128], strides = [1, 1]} : vector<1x512xf32> to vector<1x128xf32>
    %88 = arith.negf %87 : vector<1x128xf32>
    %89 = math.exp %88 : vector<1x128xf32>
    %cst_30 = arith.constant 1.000000e+00 : f32
    %90 = vector.broadcast %cst_30 : f32 to vector<1x128xf32>
    %91 = arith.addf %90, %89 : vector<1x128xf32>
    %92 = arith.divf %90, %91 : vector<1x128xf32>
    %93 = vector.extract_strided_slice %80 {offsets = [0, 256], sizes = [1, 128], strides = [1, 1]} : vector<1x512xf32> to vector<1x128xf32>
    %94 = math.tanh %93 : vector<1x128xf32>
    %95 = vector.extract_strided_slice %80 {offsets = [0, 384], sizes = [1, 128], strides = [1, 1]} : vector<1x512xf32> to vector<1x128xf32>
    %96 = arith.negf %95 : vector<1x128xf32>
    %97 = math.exp %96 : vector<1x128xf32>
    %cst_31 = arith.constant 1.000000e+00 : f32
    %98 = vector.broadcast %cst_31 : f32 to vector<1x128xf32>
    %99 = arith.addf %98, %97 : vector<1x128xf32>
    %100 = arith.divf %98, %99 : vector<1x128xf32>
    %101 = arith.mulf %92, %70 : vector<1x128xf32>
    %102 = arith.mulf %86, %94 : vector<1x128xf32>
    %103 = arith.addf %101, %102 : vector<1x128xf32>
    %104 = math.tanh %103 : vector<1x128xf32>
    %105 = arith.mulf %100, %104 : vector<1x128xf32>
    %106 = arith.index_cast %c2_i32 : i32 to index
    %c0_32 = arith.constant 0 : index
    %107 = vector.load %arg11[%106, %c0_32] : memref<8x128xf32, #tpu.memory_space<vmem>>, vector<1x128xf32>
    tpu.vector_store %arg11[%106, %c0_32], %105 {strides = array<i32>} : memref<8x128xf32, #tpu.memory_space<vmem>>, vector<1x128xf32>,
    %c3_i32 = arith.constant 3 : i32
    %108 = arith.index_cast %c3_i32 : i32 to index
    %c0_33 = arith.constant 0 : index
    %109 = vector.load %arg12[%108, %c0_33] : memref<8x512xf32, #tpu.memory_space<vmem>>, vector<1x512xf32>
    %110 = arith.truncf %105 : vector<1x128xf32> to vector<1x128xbf16>
    %c0_34 = arith.constant 0 : index
    %c0_35 = arith.constant 0 : index
    %111 = vector.load %arg2[%c0_34, %c0_35] : memref<128x512xbf16, #tpu.memory_space<vmem>>, vector<128x512xbf16>
    %cst_36 = arith.constant dense<0.000000e+00> : vector<1x512xf32>
    %112 = tpu.matmul %110, %111, %cst_36 {dimension_numbers = #tpu.dot_dimension_numbers<[1], [0], [0], [1], [0, 0, 1, 1], [], []>} : vector<1x128xbf16>, vector<128x512xbf16>, vector<1x512xf32> -> vector<1x512xf32>
    %113 = arith.addf %109, %112 : vector<1x512xf32>
    %114 = vector.extract_strided_slice %113 {offsets = [0, 0], sizes = [1, 128], strides = [1, 1]} : vector<1x512xf32> to vector<1x128xf32>
    %115 = arith.negf %114 : vector<1x128xf32>
    %116 = math.exp %115 : vector<1x128xf32>
    %cst_37 = arith.constant 1.000000e+00 : f32
    %117 = vector.broadcast %cst_37 : f32 to vector<1x128xf32>
    %118 = arith.addf %117, %116 : vector<1x128xf32>
    %119 = arith.divf %117, %118 : vector<1x128xf32>
    %120 = vector.extract_strided_slice %113 {offsets = [0, 128], sizes = [1, 128], strides = [1, 1]} : vector<1x512xf32> to vector<1x128xf32>
    %121 = arith.negf %120 : vector<1x128xf32>
    %122 = math.exp %121 : vector<1x128xf32>
    %cst_38 = arith.constant 1.000000e+00 : f32
    %123 = vector.broadcast %cst_38 : f32 to vector<1x128xf32>
    %124 = arith.addf %123, %122 : vector<1x128xf32>
    %125 = arith.divf %123, %124 : vector<1x128xf32>
    %126 = vector.extract_strided_slice %113 {offsets = [0, 256], sizes = [1, 128], strides = [1, 1]} : vector<1x512xf32> to vector<1x128xf32>
    %127 = math.tanh %126 : vector<1x128xf32>
    %128 = vector.extract_strided_slice %113 {offsets = [0, 384], sizes = [1, 128], strides = [1, 1]} : vector<1x512xf32> to vector<1x128xf32>
    %129 = arith.negf %128 : vector<1x128xf32>
    %130 = math.exp %129 : vector<1x128xf32>
    %cst_39 = arith.constant 1.000000e+00 : f32
    %131 = vector.broadcast %cst_39 : f32 to vector<1x128xf32>
    %132 = arith.addf %131, %130 : vector<1x128xf32>
    %133 = arith.divf %131, %132 : vector<1x128xf32>
    %134 = arith.mulf %125, %103 : vector<1x128xf32>
    %135 = arith.mulf %119, %127 : vector<1x128xf32>
    %136 = arith.addf %134, %135 : vector<1x128xf32>
    %137 = math.tanh %136 : vector<1x128xf32>
    %138 = arith.mulf %133, %137 : vector<1x128xf32>
    %139 = arith.index_cast %c3_i32 : i32 to index
    %c0_40 = arith.constant 0 : index
    %140 = vector.load %arg11[%139, %c0_40] : memref<8x128xf32, #tpu.memory_space<vmem>>, vector<1x128xf32>
    tpu.vector_store %arg11[%139, %c0_40], %138 {strides = array<i32>} : memref<8x128xf32, #tpu.memory_space<vmem>>, vector<1x128xf32>,
    %c4_i32 = arith.constant 4 : i32
    %141 = arith.index_cast %c4_i32 : i32 to index
    %c0_41 = arith.constant 0 : index
    %142 = vector.load %arg12[%141, %c0_41] : memref<8x512xf32, #tpu.memory_space<vmem>>, vector<1x512xf32>
    %143 = arith.truncf %138 : vector<1x128xf32> to vector<1x128xbf16>
    %c0_42 = arith.constant 0 : index
    %c0_43 = arith.constant 0 : index
    %144 = vector.load %arg2[%c0_42, %c0_43] : memref<128x512xbf16, #tpu.memory_space<vmem>>, vector<128x512xbf16>
    %cst_44 = arith.constant dense<0.000000e+00> : vector<1x512xf32>
    %145 = tpu.matmul %143, %144, %cst_44 {dimension_numbers = #tpu.dot_dimension_numbers<[1], [0], [0], [1], [0, 0, 1, 1], [], []>} : vector<1x128xbf16>, vector<128x512xbf16>, vector<1x512xf32> -> vector<1x512xf32>
    %146 = arith.addf %142, %145 : vector<1x512xf32>
    %147 = vector.extract_strided_slice %146 {offsets = [0, 0], sizes = [1, 128], strides = [1, 1]} : vector<1x512xf32> to vector<1x128xf32>
    %148 = arith.negf %147 : vector<1x128xf32>
    %149 = math.exp %148 : vector<1x128xf32>
    %cst_45 = arith.constant 1.000000e+00 : f32
    %150 = vector.broadcast %cst_45 : f32 to vector<1x128xf32>
    %151 = arith.addf %150, %149 : vector<1x128xf32>
    %152 = arith.divf %150, %151 : vector<1x128xf32>
    %153 = vector.extract_strided_slice %146 {offsets = [0, 128], sizes = [1, 128], strides = [1, 1]} : vector<1x512xf32> to vector<1x128xf32>
    %154 = arith.negf %153 : vector<1x128xf32>
    %155 = math.exp %154 : vector<1x128xf32>
    %cst_46 = arith.constant 1.000000e+00 : f32
    %156 = vector.broadcast %cst_46 : f32 to vector<1x128xf32>
    %157 = arith.addf %156, %155 : vector<1x128xf32>
    %158 = arith.divf %156, %157 : vector<1x128xf32>
    %159 = vector.extract_strided_slice %146 {offsets = [0, 256], sizes = [1, 128], strides = [1, 1]} : vector<1x512xf32> to vector<1x128xf32>
    %160 = math.tanh %159 : vector<1x128xf32>
    %161 = vector.extract_strided_slice %146 {offsets = [0, 384], sizes = [1, 128], strides = [1, 1]} : vector<1x512xf32> to vector<1x128xf32>
    %162 = arith.negf %161 : vector<1x128xf32>
    %163 = math.exp %162 : vector<1x128xf32>
    %cst_47 = arith.constant 1.000000e+00 : f32
    %164 = vector.broadcast %cst_47 : f32 to vector<1x128xf32>
    %165 = arith.addf %164, %163 : vector<1x128xf32>
    %166 = arith.divf %164, %165 : vector<1x128xf32>
    %167 = arith.mulf %158, %136 : vector<1x128xf32>
    %168 = arith.mulf %152, %160 : vector<1x128xf32>
    %169 = arith.addf %167, %168 : vector<1x128xf32>
    %170 = math.tanh %169 : vector<1x128xf32>
    %171 = arith.mulf %166, %170 : vector<1x128xf32>
    %172 = arith.index_cast %c4_i32 : i32 to index
    %c0_48 = arith.constant 0 : index
    %173 = vector.load %arg11[%172, %c0_48] : memref<8x128xf32, #tpu.memory_space<vmem>>, vector<1x128xf32>
    tpu.vector_store %arg11[%172, %c0_48], %171 {strides = array<i32>} : memref<8x128xf32, #tpu.memory_space<vmem>>, vector<1x128xf32>,
    %c5_i32 = arith.constant 5 : i32
    %174 = arith.index_cast %c5_i32 : i32 to index
    %c0_49 = arith.constant 0 : index
    %175 = vector.load %arg12[%174, %c0_49] : memref<8x512xf32, #tpu.memory_space<vmem>>, vector<1x512xf32>
    %176 = arith.truncf %171 : vector<1x128xf32> to vector<1x128xbf16>
    %c0_50 = arith.constant 0 : index
    %c0_51 = arith.constant 0 : index
    %177 = vector.load %arg2[%c0_50, %c0_51] : memref<128x512xbf16, #tpu.memory_space<vmem>>, vector<128x512xbf16>
    %cst_52 = arith.constant dense<0.000000e+00> : vector<1x512xf32>
    %178 = tpu.matmul %176, %177, %cst_52 {dimension_numbers = #tpu.dot_dimension_numbers<[1], [0], [0], [1], [0, 0, 1, 1], [], []>} : vector<1x128xbf16>, vector<128x512xbf16>, vector<1x512xf32> -> vector<1x512xf32>
    %179 = arith.addf %175, %178 : vector<1x512xf32>
    %180 = vector.extract_strided_slice %179 {offsets = [0, 0], sizes = [1, 128], strides = [1, 1]} : vector<1x512xf32> to vector<1x128xf32>
    %181 = arith.negf %180 : vector<1x128xf32>
    %182 = math.exp %181 : vector<1x128xf32>
    %cst_53 = arith.constant 1.000000e+00 : f32
    %183 = vector.broadcast %cst_53 : f32 to vector<1x128xf32>
    %184 = arith.addf %183, %182 : vector<1x128xf32>
    %185 = arith.divf %183, %184 : vector<1x128xf32>
    %186 = vector.extract_strided_slice %179 {offsets = [0, 128], sizes = [1, 128], strides = [1, 1]} : vector<1x512xf32> to vector<1x128xf32>
    %187 = arith.negf %186 : vector<1x128xf32>
    %188 = math.exp %187 : vector<1x128xf32>
    %cst_54 = arith.constant 1.000000e+00 : f32
    %189 = vector.broadcast %cst_54 : f32 to vector<1x128xf32>
    %190 = arith.addf %189, %188 : vector<1x128xf32>
    %191 = arith.divf %189, %190 : vector<1x128xf32>
    %192 = vector.extract_strided_slice %179 {offsets = [0, 256], sizes = [1, 128], strides = [1, 1]} : vector<1x512xf32> to vector<1x128xf32>
    %193 = math.tanh %192 : vector<1x128xf32>
    %194 = vector.extract_strided_slice %179 {offsets = [0, 384], sizes = [1, 128], strides = [1, 1]} : vector<1x512xf32> to vector<1x128xf32>
    %195 = arith.negf %194 : vector<1x128xf32>
    %196 = math.exp %195 : vector<1x128xf32>
    %cst_55 = arith.constant 1.000000e+00 : f32
    %197 = vector.broadcast %cst_55 : f32 to vector<1x128xf32>
    %198 = arith.addf %197, %196 : vector<1x128xf32>
    %199 = arith.divf %197, %198 : vector<1x128xf32>
    %200 = arith.mulf %191, %169 : vector<1x128xf32>
    %201 = arith.mulf %185, %193 : vector<1x128xf32>
    %202 = arith.addf %200, %201 : vector<1x128xf32>
    %203 = math.tanh %202 : vector<1x128xf32>
    %204 = arith.mulf %199, %203 : vector<1x128xf32>
    %205 = arith.index_cast %c5_i32 : i32 to index
    %c0_56 = arith.constant 0 : index
    %206 = vector.load %arg11[%205, %c0_56] : memref<8x128xf32, #tpu.memory_space<vmem>>, vector<1x128xf32>
    tpu.vector_store %arg11[%205, %c0_56], %204 {strides = array<i32>} : memref<8x128xf32, #tpu.memory_space<vmem>>, vector<1x128xf32>,
    %c6_i32 = arith.constant 6 : i32
    %207 = arith.index_cast %c6_i32 : i32 to index
    %c0_57 = arith.constant 0 : index
    %208 = vector.load %arg12[%207, %c0_57] : memref<8x512xf32, #tpu.memory_space<vmem>>, vector<1x512xf32>
    %209 = arith.truncf %204 : vector<1x128xf32> to vector<1x128xbf16>
    %c0_58 = arith.constant 0 : index
    %c0_59 = arith.constant 0 : index
    %210 = vector.load %arg2[%c0_58, %c0_59] : memref<128x512xbf16, #tpu.memory_space<vmem>>, vector<128x512xbf16>
    %cst_60 = arith.constant dense<0.000000e+00> : vector<1x512xf32>
    %211 = tpu.matmul %209, %210, %cst_60 {dimension_numbers = #tpu.dot_dimension_numbers<[1], [0], [0], [1], [0, 0, 1, 1], [], []>} : vector<1x128xbf16>, vector<128x512xbf16>, vector<1x512xf32> -> vector<1x512xf32>
    %212 = arith.addf %208, %211 : vector<1x512xf32>
    %213 = vector.extract_strided_slice %212 {offsets = [0, 0], sizes = [1, 128], strides = [1, 1]} : vector<1x512xf32> to vector<1x128xf32>
    %214 = arith.negf %213 : vector<1x128xf32>
    %215 = math.exp %214 : vector<1x128xf32>
    %cst_61 = arith.constant 1.000000e+00 : f32
    %216 = vector.broadcast %cst_61 : f32 to vector<1x128xf32>
    %217 = arith.addf %216, %215 : vector<1x128xf32>
    %218 = arith.divf %216, %217 : vector<1x128xf32>
    %219 = vector.extract_strided_slice %212 {offsets = [0, 128], sizes = [1, 128], strides = [1, 1]} : vector<1x512xf32> to vector<1x128xf32>
    %220 = arith.negf %219 : vector<1x128xf32>
    %221 = math.exp %220 : vector<1x128xf32>
    %cst_62 = arith.constant 1.000000e+00 : f32
    %222 = vector.broadcast %cst_62 : f32 to vector<1x128xf32>
    %223 = arith.addf %222, %221 : vector<1x128xf32>
    %224 = arith.divf %222, %223 : vector<1x128xf32>
    %225 = vector.extract_strided_slice %212 {offsets = [0, 256], sizes = [1, 128], strides = [1, 1]} : vector<1x512xf32> to vector<1x128xf32>
    %226 = math.tanh %225 : vector<1x128xf32>
    %227 = vector.extract_strided_slice %212 {offsets = [0, 384], sizes = [1, 128], strides = [1, 1]} : vector<1x512xf32> to vector<1x128xf32>
    %228 = arith.negf %227 : vector<1x128xf32>
    %229 = math.exp %228 : vector<1x128xf32>
    %cst_63 = arith.constant 1.000000e+00 : f32
    %230 = vector.broadcast %cst_63 : f32 to vector<1x128xf32>
    %231 = arith.addf %230, %229 : vector<1x128xf32>
    %232 = arith.divf %230, %231 : vector<1x128xf32>
    %233 = arith.mulf %224, %202 : vector<1x128xf32>
    %234 = arith.mulf %218, %226 : vector<1x128xf32>
    %235 = arith.addf %233, %234 : vector<1x128xf32>
    %236 = math.tanh %235 : vector<1x128xf32>
    %237 = arith.mulf %232, %236 : vector<1x128xf32>
    %238 = arith.index_cast %c6_i32 : i32 to index
    %c0_64 = arith.constant 0 : index
    %239 = vector.load %arg11[%238, %c0_64] : memref<8x128xf32, #tpu.memory_space<vmem>>, vector<1x128xf32>
    tpu.vector_store %arg11[%238, %c0_64], %237 {strides = array<i32>} : memref<8x128xf32, #tpu.memory_space<vmem>>, vector<1x128xf32>,
    %c7_i32 = arith.constant 7 : i32
    %240 = arith.index_cast %c7_i32 : i32 to index
    %c0_65 = arith.constant 0 : index
    %241 = vector.load %arg12[%240, %c0_65] : memref<8x512xf32, #tpu.memory_space<vmem>>, vector<1x512xf32>
    %242 = arith.truncf %237 : vector<1x128xf32> to vector<1x128xbf16>
    %c0_66 = arith.constant 0 : index
    %c0_67 = arith.constant 0 : index
    %243 = vector.load %arg2[%c0_66, %c0_67] : memref<128x512xbf16, #tpu.memory_space<vmem>>, vector<128x512xbf16>
    %cst_68 = arith.constant dense<0.000000e+00> : vector<1x512xf32>
    %244 = tpu.matmul %242, %243, %cst_68 {dimension_numbers = #tpu.dot_dimension_numbers<[1], [0], [0], [1], [0, 0, 1, 1], [], []>} : vector<1x128xbf16>, vector<128x512xbf16>, vector<1x512xf32> -> vector<1x512xf32>
    %245 = arith.addf %241, %244 : vector<1x512xf32>
    %246 = vector.extract_strided_slice %245 {offsets = [0, 0], sizes = [1, 128], strides = [1, 1]} : vector<1x512xf32> to vector<1x128xf32>
    %247 = arith.negf %246 : vector<1x128xf32>
    %248 = math.exp %247 : vector<1x128xf32>
    %cst_69 = arith.constant 1.000000e+00 : f32
    %249 = vector.broadcast %cst_69 : f32 to vector<1x128xf32>
    %250 = arith.addf %249, %248 : vector<1x128xf32>
    %251 = arith.divf %249, %250 : vector<1x128xf32>
    %252 = vector.extract_strided_slice %245 {offsets = [0, 128], sizes = [1, 128], strides = [1, 1]} : vector<1x512xf32> to vector<1x128xf32>
    %253 = arith.negf %252 : vector<1x128xf32>
    %254 = math.exp %253 : vector<1x128xf32>
    %cst_70 = arith.constant 1.000000e+00 : f32
    %255 = vector.broadcast %cst_70 : f32 to vector<1x128xf32>
    %256 = arith.addf %255, %254 : vector<1x128xf32>
    %257 = arith.divf %255, %256 : vector<1x128xf32>
    %258 = vector.extract_strided_slice %245 {offsets = [0, 256], sizes = [1, 128], strides = [1, 1]} : vector<1x512xf32> to vector<1x128xf32>
    %259 = math.tanh %258 : vector<1x128xf32>
    %260 = vector.extract_strided_slice %245 {offsets = [0, 384], sizes = [1, 128], strides = [1, 1]} : vector<1x512xf32> to vector<1x128xf32>
    %261 = arith.negf %260 : vector<1x128xf32>
    %262 = math.exp %261 : vector<1x128xf32>
    %cst_71 = arith.constant 1.000000e+00 : f32
    %263 = vector.broadcast %cst_71 : f32 to vector<1x128xf32>
    %264 = arith.addf %263, %262 : vector<1x128xf32>
    %265 = arith.divf %263, %264 : vector<1x128xf32>
    %266 = arith.mulf %257, %235 : vector<1x128xf32>
    %267 = arith.mulf %251, %259 : vector<1x128xf32>
    %268 = arith.addf %266, %267 : vector<1x128xf32>
    %269 = math.tanh %268 : vector<1x128xf32>
    %270 = arith.mulf %265, %269 : vector<1x128xf32>
    %271 = arith.index_cast %c7_i32 : i32 to index
    %c0_72 = arith.constant 0 : index
    %272 = vector.load %arg11[%271, %c0_72] : memref<8x128xf32, #tpu.memory_space<vmem>>, vector<1x128xf32>
    tpu.vector_store %arg11[%271, %c0_72], %270 {strides = array<i32>} : memref<8x128xf32, #tpu.memory_space<vmem>>, vector<1x128xf32>,
    %c8_i32 = arith.constant 8 : i32
    %c0_73 = arith.constant 0 : index
    %c0_74 = arith.constant 0 : index
    %273 = vector.load %arg11[%c0_73, %c0_74] : memref<8x128xf32, #tpu.memory_space<vmem>>, vector<8x128xf32>
    %274 = arith.truncf %273 : vector<8x128xf32> to vector<8x128xbf16>
    %c0_75 = arith.constant 0 : index
    %c0_76 = arith.constant 0 : index
    %275 = vector.load %arg4[%c0_75, %c0_76] : memref<128x128xbf16, #tpu.memory_space<vmem>>, vector<128x128xbf16>
    %cst_77 = arith.constant dense<0.000000e+00> : vector<8x128xf32>
    %276 = tpu.matmul %274, %275, %cst_77 {dimension_numbers = #tpu.dot_dimension_numbers<[1], [0], [0], [1], [0, 0, 1, 1], [], []>} : vector<8x128xbf16>, vector<128x128xbf16>, vector<8x128xf32> -> vector<8x128xf32>
    %c0_78 = arith.constant 0 : index
    %c0_79 = arith.constant 0 : index
    %277 = vector.load %arg5[%c0_78, %c0_79] : memref<1x128xf32, #tpu.memory_space<vmem>>, vector<1x128xf32>
    %278 = vector.broadcast %277 : vector<1x128xf32> to vector<8x128xf32>
    %279 = arith.addf %276, %278 : vector<8x128xf32>
    %cst_80 = arith.constant 0.000000e+00 : f32
    %280 = vector.broadcast %cst_80 : f32 to vector<8x128xf32>
    %281 = arith.maximumf %279, %280 : vector<8x128xf32>
    %282 = arith.truncf %281 : vector<8x128xf32> to vector<8x128xbf16>
    %c0_81 = arith.constant 0 : index
    %c0_82 = arith.constant 0 : index
    %283 = vector.load %arg6[%c0_81, %c0_82] : memref<128x128xbf16, #tpu.memory_space<vmem>>, vector<128x128xbf16>
    %cst_83 = arith.constant dense<0.000000e+00> : vector<8x128xf32>
    %284 = tpu.matmul %282, %283, %cst_83 {dimension_numbers = #tpu.dot_dimension_numbers<[1], [0], [0], [1], [0, 0, 1, 1], [], []>} : vector<8x128xbf16>, vector<128x128xbf16>, vector<8x128xf32> -> vector<8x128xf32>
    %c0_84 = arith.constant 0 : index
    %c0_85 = arith.constant 0 : index
    %285 = vector.load %arg7[%c0_84, %c0_85] : memref<1x128xf32, #tpu.memory_space<vmem>>, vector<1x128xf32>
    %286 = vector.broadcast %285 : vector<1x128xf32> to vector<8x128xf32>
    %287 = arith.addf %284, %286 : vector<8x128xf32>
    %cst_86 = arith.constant 0.000000e+00 : f32
    %288 = vector.broadcast %cst_86 : f32 to vector<8x128xf32>
    %289 = arith.maximumf %287, %288 : vector<8x128xf32>
    %290 = arith.truncf %289 : vector<8x128xf32> to vector<8x128xbf16>
    %c0_87 = arith.constant 0 : index
    %c0_88 = arith.constant 0 : index
    %291 = vector.load %arg8[%c0_87, %c0_88] : memref<128x128xbf16, #tpu.memory_space<vmem>>, vector<128x128xbf16>
    %cst_89 = arith.constant dense<0.000000e+00> : vector<8x128xf32>
    %292 = tpu.matmul %290, %291, %cst_89 {dimension_numbers = #tpu.dot_dimension_numbers<[1], [0], [0], [1], [0, 0, 1, 1], [], []>} : vector<8x128xbf16>, vector<128x128xbf16>, vector<8x128xf32> -> vector<8x128xf32>
    %c0_90 = arith.constant 0 : index
    %c0_91 = arith.constant 0 : index
    %293 = vector.load %arg9[%c0_90, %c0_91] : memref<1x128xf32, #tpu.memory_space<vmem>>, vector<1x128xf32>
    %294 = vector.broadcast %293 : vector<1x128xf32> to vector<8x128xf32>
    %295 = arith.addf %292, %294 : vector<8x128xf32>
    %c0_92 = arith.constant 0 : index
    %c0_93 = arith.constant 0 : index
    %296 = vector.load %arg10[%c0_92, %c0_93] : memref<8x128xf32, #tpu.memory_space<vmem>>, vector<8x128xf32>
    tpu.vector_store %arg10[%c0_92, %c0_93], %295 {strides = array<i32>} : memref<8x128xf32, #tpu.memory_space<vmem>>, vector<8x128xf32>,
    return
  }
}

</mosaic_0001>

<bundles_post_ra>
// kernel: lstm_classifier_forward.1
= control target key start
LH: loop header
LB: loop body
LE: loop exit
PB: predicated region body
PF: predicated region fallthrough
CT: control target
= control target key end

     0   :  { %v4117_v1 = vmov 0   ;;  %vm4120_vm0 = vmmov 0   ;;  %s5042_s1 = inlined_call_operand.vmem [shape: bf16[128,512], index: 1, kind: input, shape index: {}]   ;;  %s5043_s2 = inlined_call_operand.vmem [shape: bf16[128,512], index: 2, kind: input, shape index: {}]   ;;  %s5044_s0 = inlined_call_operand.vmem [shape: bf16[8,128], index: 0, kind: input, shape index: {}]   ;;  %s5045_s3 = inlined_call_operand.vmem [shape: f32[1,512], index: 3, kind: input, shape index: {}]   ;;  %s5046_s4 = inlined_call_operand.vmem [shape: bf16[128,128], index: 4, kind: input, shape index: {}]   ;;  %s5047_s6 = inlined_call_operand.vmem [shape: bf16[128,128], index: 6, kind: input, shape index: {}]   ;;  %s5048_s8 = inlined_call_operand.vmem [shape: bf16[128,128], index: 8, kind: input, shape index: {}]   ;;  %s5049_s5 = inlined_call_operand.vmem [shape: f32[1,128], index: 5, kind: input, shape index: {}]   ;;  %s5050_s7 = inlined_call_operand.vmem [shape: f32[1,128], index: 7, kind: input, shape index: {}]   ;;  %s5051_s9 = inlined_call_operand.vmem [shape: f32[1,128], index: 9, kind: input, shape index: {}]   ;;  %s5052_s10 = inlined_call_operand.vmem [shape: f32[8,128], index: 10, kind: output, shape index: {}]  }
   0x1   :  { %v3821_v0 = vld [vmem:[%s5042_s1 + $0x4] ss:$16 sps:$4 sm:$0xff]   ;;  %283 = vmatprep.mubr.bf16.mxu0 %v4117_v1  ;;  %324 = vmatprep.mubr.bf16.mxu1 %v4117_v1  ;;  %v3823_v2 = vld [vmem:[%s5042_s1 + $0xc] ss:$16 sps:$4 sm:$0xff]   ;;  %v3825_v3 = vld [vmem:[%s5042_s1] ss:$16 sps:$4 sm:$0xff]  }
   0x2   :  { %251 = vmatprep.subr.bf16.mxu0 %v3821_v0  ;;  %v3826_v4 = vld [vmem:[%s5042_s1 + $0x8] ss:$16 sps:$4 sm:$0xff]   ;;  %292 = vmatprep.subr.bf16.mxu1 %v3823_v2  ;;  %v3827_v5 = vld [vmem:[%s5042_s1 + $0x24] ss:$16 sps:$4 sm:$0xff]   ;;  %v3829_v6 = vld [vmem:[%s5042_s1 + $0x2c] ss:$16 sps:$4 sm:$0xff]  }
   0x3   :  { %252 = vmatpush1.bf16.msra.mxu0 %v3825_v3  ;;  %293 = vmatpush1.bf16.msra.mxu1 %v3826_v4  ;;  %v3831_v7 = vld [vmem:[%s5042_s1 + $0x20] ss:$16 sps:$4 sm:$0xff]   ;;  %v3832_v8 = vld [vmem:[%s5042_s1 + $0x28] ss:$16 sps:$4 sm:$0xff]   ;;  %v3833_v9 = vld [vmem:[%s5042_s1 + $0x44] ss:$16 sps:$4 sm:$0xff]   ;;  %v71_v3 = vlaneseq }
   0x4   :  { %253 = vmatprep.subr.bf16.mxu0 %v3827_v5  ;;  %294 = vmatprep.subr.bf16.mxu1 %v3829_v6  ;;  %v3835_v10 = vld [vmem:[%s5042_s1 + $0x4c] ss:$16 sps:$4 sm:$0xff]   ;;  %v3837_v11 = vld [vmem:[%s5042_s1 + $0x40] ss:$16 sps:$4 sm:$0xff]   ;;  %v3838_v12 = vld [vmem:[%s5042_s1 + $0x48] ss:$16 sps:$4 sm:$0xff]  }
   0x5   :  { %v3839_v13 = vld [vmem:[%s5042_s1 + $0x64] ss:$16 sps:$4 sm:$0xff]   ;;  %v3841_v14 = vld [vmem:[%s5042_s1 + $0x6c] ss:$16 sps:$4 sm:$0xff]   ;;  %v3843_v15 = vld [vmem:[%s5042_s1 + $0x60] ss:$16 sps:$4 sm:$0xff]  }
   0x6   :  { %v3844_v16 = vld [vmem:[%s5042_s1 + $0x68] ss:$16 sps:$4 sm:$0xff]   ;;  %v3845_v17 = vld [vmem:[%s5042_s1 + $0x84] ss:$16 sps:$4 sm:$0xff]   ;;  %v3847_v18 = vld [vmem:[%s5042_s1 + $0x8c] ss:$16 sps:$4 sm:$0xff]  }
   0x7   :  { %254 = vmatpush1.bf16.msra.mxu0 %v3831_v7  ;;  %295 = vmatpush1.bf16.msra.mxu1 %v3832_v8  ;;  %v3849_v19 = vld [vmem:[%s5042_s1 + $0x80] ss:$16 sps:$4 sm:$0xff]   ;;  %v3850_v20 = vld [vmem:[%s5042_s1 + $0x88] ss:$16 sps:$4 sm:$0xff]   ;;  %v3851_v21 = vld [vmem:[%s5042_s1 + $0xa4] ss:$16 sps:$4 sm:$0xff]  }
   0x8   :  { %255 = vmatprep.subr.bf16.mxu0 %v3833_v9  ;;  %296 = vmatprep.subr.bf16.mxu1 %v3835_v10  ;;  %v3853_v22 = vld [vmem:[%s5042_s1 + $0xac] ss:$16 sps:$4 sm:$0xff]   ;;  %v3855_v23 = vld [vmem:[%s5042_s1 + $0xa0] ss:$16 sps:$4 sm:$0xff]   ;;  %v3856_v24 = vld [vmem:[%s5042_s1 + $0xa8] ss:$16 sps:$4 sm:$0xff]  }
   0x9   :  { %v3857_v25 = vld [vmem:[%s5042_s1 + $0xc4] ss:$16 sps:$4 sm:$0xff]   ;;  %v3859_v26 = vld [vmem:[%s5042_s1 + $0xcc] ss:$16 sps:$4 sm:$0xff]   ;;  %v3861_v27 = vld [vmem:[%s5042_s1 + $0xc0] ss:$16 sps:$4 sm:$0xff]  }
   0xa   :  { %v3862_v28 = vld [vmem:[%s5042_s1 + $0xc8] ss:$16 sps:$4 sm:$0xff]   ;;  %v3863_v29 = vld [vmem:[%s5042_s1 + $0xe4] ss:$16 sps:$4 sm:$0xff]   ;;  %v3865_v30 = vld [vmem:[%s5042_s1 + $0xec] ss:$16 sps:$4 sm:$0xff]  }
   0xb   :  { %256 = vmatpush1.bf16.msra.mxu0 %v3837_v11  ;;  %297 = vmatpush1.bf16.msra.mxu1 %v3838_v12  ;;  %v3867_v31 = vld [vmem:[%s5042_s1 + $0xe0] ss:$16 sps:$4 sm:$0xff]   ;;  %v3868_v32 = vld [vmem:[%s5042_s1 + $0xe8] ss:$16 sps:$4 sm:$0xff]   ;;  %v4277_v33 = vld [vmem:[%s5043_s2 + $0x4] ss:$16 sps:$4 sm:$0xff]  }
   0xc   :  { %257 = vmatprep.subr.bf16.mxu0 %v3839_v13  ;;  %298 = vmatprep.subr.bf16.mxu1 %v3841_v14  ;;  %v4282_v34 = vld [vmem:[%s5043_s2 + $0xc] ss:$16 sps:$4 sm:$0xff]   ;;  %v36_v35 = vld [vmem:[%s5044_s0] sm:$0xf]  ;;  %v4295_v37 = vld [vmem:[%s5043_s2 + $0x8] ss:$16 sps:$4 sm:$0xff]  }
   0xd   :  { %v4290_v36 = vld [vmem:[%s5043_s2] ss:$16 sps:$4 sm:$0xff]   ;;  %v4302_v38 = vld [vmem:[%s5043_s2 + $0x24] ss:$16 sps:$4 sm:$0xff]   ;;  %v4307_v39 = vld [vmem:[%s5043_s2 + $0x2c] ss:$16 sps:$4 sm:$0xff]  }
   0xe   :  { %v4312_v40 = vld [vmem:[%s5043_s2 + $0x20] ss:$16 sps:$4 sm:$0xff]   ;;  %v4319_v41 = vld [vmem:[%s5043_s2 + $0x28] ss:$16 sps:$4 sm:$0xff]   ;;  %v4326_v42 = vld [vmem:[%s5043_s2 + $0x44] ss:$16 sps:$4 sm:$0xff]  }
   0xf   :  { %258 = vmatpush1.bf16.msra.mxu0 %v3843_v15  ;;  %299 = vmatpush1.bf16.msra.mxu1 %v3844_v16  ;;  %v4331_v43 = vld [vmem:[%s5043_s2 + $0x4c] ss:$16 sps:$4 sm:$0xff]   ;;  %v4338_v44 = vld [vmem:[%s5043_s2 + $0x40] ss:$16 sps:$4 sm:$0xff]   ;;  %v4345_v45 = vld [vmem:[%s5043_s2 + $0x48] ss:$16 sps:$4 sm:$0xff]  }
  0x10   :  { %259 = vmatprep.subr.bf16.mxu0 %v3845_v17  ;;  %300 = vmatprep.subr.bf16.mxu1 %v3847_v18  ;;  %v4352_v46 = vld [vmem:[%s5043_s2 + $0x64] ss:$16 sps:$4 sm:$0xff]   ;;  %v4357_v47 = vld [vmem:[%s5043_s2 + $0x6c] ss:$16 sps:$4 sm:$0xff]   ;;  %v4362_v48 = vld [vmem:[%s5043_s2 + $0x60] ss:$16 sps:$4 sm:$0xff]  }
  0x11   :  { %v4367_v49 = vld [vmem:[%s5043_s2 + $0x68] ss:$16 sps:$4 sm:$0xff]   ;;  %v4372_v50 = vld [vmem:[%s5043_s2 + $0x84] ss:$16 sps:$4 sm:$0xff]   ;;  %v4377_v51 = vld [vmem:[%s5043_s2 + $0x8c] ss:$16 sps:$4 sm:$0xff]  }
  0x12   :  { %v4386_v52 = vld [vmem:[%s5043_s2 + $0x80] ss:$16 sps:$4 sm:$0xff]   ;;  %v4391_v53 = vld [vmem:[%s5043_s2 + $0x88] ss:$16 sps:$4 sm:$0xff]   ;;  %v4396_v54 = vld [vmem:[%s5043_s2 + $0xa4] ss:$16 sps:$4 sm:$0xff]  }
  0x13   :  { %260 = vmatpush1.bf16.msra.mxu0 %v3849_v19  ;;  %301 = vmatpush1.bf16.msra.mxu1 %v3850_v20  ;;  %v4401_v55 = vld [vmem:[%s5043_s2 + $0xac] ss:$16 sps:$4 sm:$0xff]   ;;  %v4410_v56 = vld [vmem:[%s5043_s2 + $0xa0] ss:$16 sps:$4 sm:$0xff]   ;;  %v4415_v57 = vld [vmem:[%s5043_s2 + $0xa8] ss:$16 sps:$4 sm:$0xff]  }
  0x14   :  { %261 = vmatprep.subr.bf16.mxu0 %v3851_v21  ;;  %302 = vmatprep.subr.bf16.mxu1 %v3853_v22  ;;  %v4420_v58 = vld [vmem:[%s5043_s2 + $0xc4] ss:$16 sps:$4 sm:$0xff]   ;;  %v4425_v59 = vld [vmem:[%s5043_s2 + $0xcc] ss:$16 sps:$4 sm:$0xff]   ;;  %v4436_v60 = vld [vmem:[%s5043_s2 + $0xc0] ss:$16 sps:$4 sm:$0xff]  }
  0x15   :  { %v4441_v61 = vld [vmem:[%s5043_s2 + $0xc8] ss:$16 sps:$4 sm:$0xff]   ;;  %v4448_v62 = vld [vmem:[%s5043_s2 + $0xe4] ss:$16 sps:$4 sm:$0xff]   ;;  %v4453_v63 = vld [vmem:[%s5043_s2 + $0xec] ss:$16 sps:$4 sm:$0xff]  }
  0x16   :  { %v4460_v0 = vld [vmem:[%s5043_s2 + $0xe0] ss:$16 sps:$4 sm:$0xff]   ;;  %v4465_v2 = vld [vmem:[%s5043_s2 + $0xe8] ss:$16 sps:$4 sm:$0xff]   ;;  %v72_v4 = vshrl.u32 %v71_v3, 7 }
  0x17   :  { %262 = vmatpush1.bf16.msra.mxu0 %v3855_v23  ;;  %303 = vmatpush1.bf16.msra.mxu1 %v3856_v24  ;;  %v69_v7 = vld [vmem:[%s5045_s3] sm:$0xf] }
  0x18   :  { %263 = vmatprep.subr.bf16.mxu0 %v3857_v25  ;;  %304 = vmatprep.subr.bf16.mxu1 %v3859_v26  ;;  %v73_v5 = vsub.s32 0, %v72_v4  ;;  %v81_v6 = vsub.s32 2, %v72_v4  ;;  %v77_v8 = vsub.s32 1, %v72_v4  ;;  %v85_v9 = vsub.s32 3, %v72_v4 }
  0x19   :  { %v4118_v26 = vmov 1966171168  }
  0x1a   :  { %v74_v10 = vrot.slane %v69_v7, %v73_v5  ;;  %v82_v11 = vrot.slane %v69_v7, %v81_v6  ;;  %v78_v12 = vrot.slane %v69_v7, %v77_v8  ;;  %v86_v13 = vrot.slane %v69_v7, %v85_v9 }
  0x1b   :  { %264 = vmatpush1.bf16.msra.mxu0 %v3861_v27  ;;  %305 = vmatpush1.bf16.msra.mxu1 %v3862_v28  ;;  %v619_v27 = vunpack.c.l.s4 %v4118_v26 }
  0x1c   :  { %265 = vmatprep.subr.bf16.mxu0 %v3863_v29  ;;  %306 = vmatprep.subr.bf16.mxu1 %v3865_v30 }
  0x1d   :  { %v620_v28 = vunpack.c.0.s8 %v619_v27 }
  0x1f   :  { %266 = vmatpush1.bf16.msra.mxu0 %v3867_v31  ;;  %307 = vmatpush1.bf16.msra.mxu1 %v3868_v32  ;;  %v4512_v29 = vsub.s32 %v620_v28, %v72_v4 }
  0x20   :  { %530 = vmatprep.subr.bf16.mxu0 %v4277_v33  ;;  %571 = vmatprep.subr.bf16.mxu1 %v4282_v34 }
  0x22   :  { %284 = vmatmul.mubr.bf16.vlgmr.msra.gmra.mrb[0].mxu0 %v36_v35  ;;  %325 = vmatmul.mubr.bf16.vlgmr.msra.gmra.mrb[0].mxu1 %v36_v35 }
  0x23   :  { %531 = vmatpush1.bf16.msra.mxu0 %v4290_v36  ;;  %572 = vmatpush1.bf16.msra.mxu1 %v4295_v37 }
  0x24   :  { %532 = vmatprep.subr.bf16.mxu0 %v4302_v38  ;;  %573 = vmatprep.subr.bf16.mxu1 %v4307_v39 }
  0x25   :  { %562 = vmatprep.mubr.bf16.mxu0 %v4117_v1  ;;  %603 = vmatprep.mubr.bf16.mxu1 %v4117_v1 }
  0x27   :  { %533 = vmatpush1.bf16.msra.mxu0 %v4312_v40  ;;  %574 = vmatpush1.bf16.msra.mxu1 %v4319_v41 }
  0x28   :  { %534 = vmatprep.subr.bf16.mxu0 %v4326_v42  ;;  %575 = vmatprep.subr.bf16.mxu1 %v4331_v43 }
  0x2b   :  { %535 = vmatpush1.bf16.msra.mxu0 %v4338_v44  ;;  %576 = vmatpush1.bf16.msra.mxu1 %v4345_v45 }
  0x2c   :  { %536 = vmatprep.subr.bf16.mxu0 %v4352_v46  ;;  %577 = vmatprep.subr.bf16.mxu1 %v4357_v47 }
  0x2f   :  { %537 = vmatpush1.bf16.msra.mxu0 %v4362_v48  ;;  %578 = vmatpush1.bf16.msra.mxu1 %v4367_v49 }
  0x30   :  { %538 = vmatprep.subr.bf16.mxu0 %v4372_v50  ;;  %579 = vmatprep.subr.bf16.mxu1 %v4377_v51 }
  0x33   :  { %539 = vmatpush1.bf16.msra.mxu0 %v4386_v52  ;;  %580 = vmatpush1.bf16.msra.mxu1 %v4391_v53 }
  0x34   :  { %540 = vmatprep.subr.bf16.mxu0 %v4396_v54  ;;  %581 = vmatprep.subr.bf16.mxu1 %v4401_v55 }
  0x37   :  { %541 = vmatpush1.bf16.msra.mxu0 %v4410_v56  ;;  %582 = vmatpush1.bf16.msra.mxu1 %v4415_v57 }
  0x38   :  { %542 = vmatprep.subr.bf16.mxu0 %v4420_v58  ;;  %583 = vmatprep.subr.bf16.mxu1 %v4425_v59 }
  0x3b   :  { %543 = vmatpush1.bf16.msra.mxu0 %v4436_v60  ;;  %584 = vmatpush1.bf16.msra.mxu1 %v4441_v61 }
  0x3c   :  { %544 = vmatprep.subr.bf16.mxu0 %v4448_v62  ;;  %585 = vmatprep.subr.bf16.mxu1 %v4453_v63 }
  0x3f   :  { %545 = vmatpush1.bf16.msra.mxu0 %v4460_v0  ;;  %586 = vmatpush1.bf16.msra.mxu1 %v4465_v2 }
  0x40   :  { %869 = vmatprep.subr.bf16.mxu0 %v4277_v33  ;;  %910 = vmatprep.subr.bf16.mxu1 %v4282_v34 }
  0x42   :  { %563 = vmatmul.mubr.bf16.vlgmr.msra.gmra.mrb[4].mxu0 %v4117_v1  ;;  %604 = vmatmul.mubr.bf16.vlgmr.msra.gmra.mrb[4].mxu1 %v4117_v1 }
  0x43   :  { %870 = vmatpush1.bf16.msra.mxu0 %v4290_v36  ;;  %911 = vmatpush1.bf16.msra.mxu1 %v4295_v37 }
  0x44   :  { %871 = vmatprep.subr.bf16.mxu0 %v4302_v38  ;;  %912 = vmatprep.subr.bf16.mxu1 %v4307_v39 }
  0x45   :  { %901 = vmatprep.mubr.bf16.mxu0 %v4117_v1  ;;  %942 = vmatprep.mubr.bf16.mxu1 %v4117_v1 }
  0x47   :  { %872 = vmatpush1.bf16.msra.mxu0 %v4312_v40  ;;  %913 = vmatpush1.bf16.msra.mxu1 %v4319_v41 }
  0x48   :  { %873 = vmatprep.subr.bf16.mxu0 %v4326_v42  ;;  %914 = vmatprep.subr.bf16.mxu1 %v4331_v43 }
  0x4b   :  { %874 = vmatpush1.bf16.msra.mxu0 %v4338_v44  ;;  %915 = vmatpush1.bf16.msra.mxu1 %v4345_v45 }
  0x4c   :  { %875 = vmatprep.subr.bf16.mxu0 %v4352_v46  ;;  %916 = vmatprep.subr.bf16.mxu1 %v4357_v47 }
  0x4f   :  { %876 = vmatpush1.bf16.msra.mxu0 %v4362_v48  ;;  %917 = vmatpush1.bf16.msra.mxu1 %v4367_v49 }
  0x50   :  { %877 = vmatprep.subr.bf16.mxu0 %v4372_v50  ;;  %918 = vmatprep.subr.bf16.mxu1 %v4377_v51 }
  0x53   :  { %878 = vmatpush1.bf16.msra.mxu0 %v4386_v52  ;;  %919 = vmatpush1.bf16.msra.mxu1 %v4391_v53 }
  0x54   :  { %879 = vmatprep.subr.bf16.mxu0 %v4396_v54  ;;  %920 = vmatprep.subr.bf16.mxu1 %v4401_v55 }
  0x57   :  { %880 = vmatpush1.bf16.msra.mxu0 %v4410_v56  ;;  %921 = vmatpush1.bf16.msra.mxu1 %v4415_v57 }
  0x58   :  { %881 = vmatprep.subr.bf16.mxu0 %v4420_v58  ;;  %922 = vmatprep.subr.bf16.mxu1 %v4425_v59 }
  0x5b   :  { %882 = vmatpush1.bf16.msra.mxu0 %v4436_v60  ;;  %923 = vmatpush1.bf16.msra.mxu1 %v4441_v61 }
  0x5c   :  { %883 = vmatprep.subr.bf16.mxu0 %v4448_v62  ;;  %924 = vmatprep.subr.bf16.mxu1 %v4453_v63 }
  0x5f   :  { %884 = vmatpush1.bf16.msra.mxu0 %v4460_v0  ;;  %925 = vmatpush1.bf16.msra.mxu1 %v4465_v2 }
  0x60   :  { %1208 = vmatprep.subr.bf16.mxu0 %v4277_v33  ;;  %1249 = vmatprep.subr.bf16.mxu1 %v4282_v34 }
  0xf5   :  { %v285_v14 = vpop.f32.mrb[0].mxu0  ;;  %v326_v15 = vpop.f32.mrb[0].mxu1 }
  0xf6   :  { %v286_v16 = vadd.f32 %v285_v14, %v74_v10  ;;  %v327_v17 = vadd.f32 %v326_v15, %v82_v11  ;;  %v287_v18 = vpop.f32.mrb[1].mxu0  ;;  %v328_v19 = vpop.f32.mrb[1].mxu1 }
  0xf7   :  { %v288_v20 = vadd.f32 %v287_v18, %v78_v12  ;;  %v329_v21 = vadd.f32 %v328_v19, %v86_v13  ;;  %v289_v22 = vpop.f32.mrb[2].mxu0  ;;  %v330_v23 = vpop.f32.mrb[2].mxu1 }
  0xf8   :  { %333 = vst [vmem:[#allocation3] sm:$0xff] %v286_v16  ;;  %335 = vst [vmem:[#allocation3 + $0x10] sm:$0xff] %v327_v17  ;;  %v290_v24 = vpop.f32.mrb[3].mxu0  ;;  %v331_v25 = vpop.f32.mrb[3].mxu1 }
  0xf9   :  { %334 = vst [vmem:[#allocation3 + $0x8] sm:$0xff] %v288_v20  ;;  %336 = vst [vmem:[#allocation3 + $0x18] sm:$0xff] %v329_v21 }
 0x100   :  { %v337_v14 = vld [vmem:[#allocation3] ss:$8 sm:$0xf] }
 0x115   :  { %v564_v30 = vpop.f32.mrb[4].mxu0  ;;  %v605_v31 = vpop.f32.mrb[4].mxu1 }
 0x116   :  { %v566_v32 = vpop.f32.mrb[5].mxu0  ;;  %v607_v35 = vpop.f32.mrb[5].mxu1 }
 0x117   :  { %v616_v3 = vcombine.low %v564_v30, %v566_v32  ;;  %v617_v5 = vcombine.low %v605_v31, %v607_v35  ;;  %v568_v6 = vpop.f32.mrb[6].mxu0  ;;  %v609_v7 = vpop.f32.mrb[6].mxu1 }
 0x118   :  { %v569_v8 = vpop.f32.mrb[7].mxu0  ;;  %v610_v9 = vpop.f32.mrb[7].mxu1 }
 0x119   :  { %v624_v10 = vrot.slane %v616_v3, %v4512_v29  ;;  %v631_v11 = vrot.slane %v617_v5, %v4512_v29 }
 0x11b   :  { %v632_v12 = vcombine.low %v624_v10, %v631_v11 }
 0x11d   :  { %v639_v13 = vrot.slane %v632_v12, %v4512_v29 }
 0x11f   :  { %v641_v4 = vadd.f32 %v639_v13, %v337_v14 }
 0x121   :  { %v3455_v15 = vmul.f32 -1.442695, %v641_v4  ;;  %v649_v16 = vrot.slane %v641_v4, 1  ;;  %v660_v18 = vrot.slane %v641_v4, 3  ;;  %v657_v21 = vrot.slane %v641_v4, 2 }
 0x123   :  { %3989 = vpow2.f32 %v3455_v15  ;;  %v3456_v17 = vmul.f32 -1.442695, %v649_v16  ;;  %v3457_v19 = vmul.f32 -1.442695, %v660_v18 }
 0x125   :  { %3991 = vpow2.f32 %v3456_v17 }
 0x126   :  { %3993 = vpow2.f32 %v3457_v19 }
 0x12d   :  { %v3990_v20 = vpop.eup %3989 }
 0x12e   :  { %v645_v22 = vadd.f32 1.0, %v3990_v20 }
 0x12f   :  { %v3992_v23 = vpop.eup %3991 }
 0x130   :  { %3995 = vrcp.f32 %v645_v22  ;;  %v654_v24 = vadd.f32 1.0, %v3992_v23  ;;  %v3994_v25 = vpop.eup %3993 }
 0x131   :  { %3997 = vtanh.f32 %v657_v21  ;;  %v665_v30 = vadd.f32 1.0, %v3994_v25 }
 0x132   :  { %3999 = vrcp.f32 %v654_v24 }
 0x133   :  { %4001 = vrcp.f32 %v665_v30 }
 0x13a   :  { %v3996_v26 = vpop.eup %3995 }
 0x13b   :  { %v3998_v27 = vpop.eup %3997 }
 0x13c   :  { %v4000_v28 = vpop.eup %3999  ;;  %v669_v32 = vmul.f32 %v3998_v27, %v3996_v26 }
 0x13d   :  { %v668_v31 = vmul.f32 0.0, %v4000_v28  ;;  %v4002_v3 = vpop.eup %4001 }
 0x13f   :  { %v4517_v35 = vadd.f32 %v669_v32, %v668_v31 }
 0x141   :  { %4003 = vtanh.f32 %v4517_v35 }
 0x14b   :  { %v4004_v5 = vpop.eup %4003 }
 0x14c   :  { %v672_v6 = vmul.f32 %v4004_v5, %v4002_v3 }
 0x14e   :  { %673 = vst [vmem:[#allocation2] sm:$0x1] %v672_v6  ;;  %v676_v7 = vpack.c.bf16 %v672_v6, %v672_v6 }
 0x150   :  { %902 = vmatmul.mubr.bf16.vlgmr.msra.gmra.mrb[8].mxu0 %v676_v7  ;;  %943 = vmatmul.mubr.bf16.vlgmr.msra.gmra.mrb[8].mxu1 %v676_v7 }
 0x151   :  { %1209 = vmatpush1.bf16.msra.mxu0 %v4290_v36  ;;  %1250 = vmatpush1.bf16.msra.mxu1 %v4295_v37 }
 0x152   :  { %1210 = vmatprep.subr.bf16.mxu0 %v4302_v38  ;;  %1251 = vmatprep.subr.bf16.mxu1 %v4307_v39 }
 0x153   :  { %1240 = vmatprep.mubr.bf16.mxu0 %v4117_v1  ;;  %1281 = vmatprep.mubr.bf16.mxu1 %v4117_v1 }
 0x155   :  { %1211 = vmatpush1.bf16.msra.mxu0 %v4312_v40  ;;  %1252 = vmatpush1.bf16.msra.mxu1 %v4319_v41 }
 0x156   :  { %1212 = vmatprep.subr.bf16.mxu0 %v4326_v42  ;;  %1253 = vmatprep.subr.bf16.mxu1 %v4331_v43 }
 0x159   :  { %1213 = vmatpush1.bf16.msra.mxu0 %v4338_v44  ;;  %1254 = vmatpush1.bf16.msra.mxu1 %v4345_v45 }
 0x15a   :  { %1214 = vmatprep.subr.bf16.mxu0 %v4352_v46  ;;  %1255 = vmatprep.subr.bf16.mxu1 %v4357_v47 }
 0x15d   :  { %1215 = vmatpush1.bf16.msra.mxu0 %v4362_v48  ;;  %1256 = vmatpush1.bf16.msra.mxu1 %v4367_v49 }
 0x15e   :  { %1216 = vmatprep.subr.bf16.mxu0 %v4372_v50  ;;  %1257 = vmatprep.subr.bf16.mxu1 %v4377_v51 }
 0x161   :  { %1217 = vmatpush1.bf16.msra.mxu0 %v4386_v52  ;;  %1258 = vmatpush1.bf16.msra.mxu1 %v4391_v53 }
 0x162   :  { %1218 = vmatprep.subr.bf16.mxu0 %v4396_v54  ;;  %1259 = vmatprep.subr.bf16.mxu1 %v4401_v55 }
 0x165   :  { %1219 = vmatpush1.bf16.msra.mxu0 %v4410_v56  ;;  %1260 = vmatpush1.bf16.msra.mxu1 %v4415_v57 }
 0x166   :  { %1220 = vmatprep.subr.bf16.mxu0 %v4420_v58  ;;  %1261 = vmatprep.subr.bf16.mxu1 %v4425_v59 }
 0x169   :  { %1221 = vmatpush1.bf16.msra.mxu0 %v4436_v60  ;;  %1262 = vmatpush1.bf16.msra.mxu1 %v4441_v61 }
 0x16a   :  { %1222 = vmatprep.subr.bf16.mxu0 %v4448_v62  ;;  %1263 = vmatprep.subr.bf16.mxu1 %v4453_v63 }
 0x16d   :  { %1223 = vmatpush1.bf16.msra.mxu0 %v4460_v0  ;;  %1264 = vmatpush1.bf16.msra.mxu1 %v4465_v2 }
 0x16e   :  { %1547 = vmatprep.subr.bf16.mxu0 %v4277_v33  ;;  %1588 = vmatprep.subr.bf16.mxu1 %v4282_v34  ;;  %v675_v33 = vld [vmem:[#allocation3 + $0x1] ss:$8 sm:$0xf] }
 0x223   :  { %v903_v8 = vpop.f32.mrb[8].mxu0  ;;  %v944_v9 = vpop.f32.mrb[8].mxu1 }
 0x224   :  { %v905_v10 = vpop.f32.mrb[9].mxu0  ;;  %v946_v11 = vpop.f32.mrb[9].mxu1 }
 0x225   :  { %v955_v12 = vcombine.low %v903_v8, %v905_v10  ;;  %v956_v13 = vcombine.low %v944_v9, %v946_v11  ;;  %v907_v14 = vpop.f32.mrb[10].mxu0  ;;  %v948_v4 = vpop.f32.mrb[10].mxu1 }
 0x226   :  { %v908_v15 = vpop.f32.mrb[11].mxu0  ;;  %v949_v16 = vpop.f32.mrb[11].mxu1 }
 0x227   :  { %v963_v17 = vrot.slane %v955_v12, %v4512_v29  ;;  %v970_v18 = vrot.slane %v956_v13, %v4512_v29 }
 0x229   :  { %v971_v19 = vcombine.low %v963_v17, %v970_v18 }
 0x22b   :  { %v978_v20 = vrot.slane %v971_v19, %v4512_v29 }
 0x22d   :  { %v980_v21 = vadd.f32 %v978_v20, %v675_v33  ;;  %v4605_v33 = vld [vmem:[%s5043_s2 + $0x4] ss:$16 sps:$4 sm:$0xff]  }
 0x22f   :  { %v3490_v34 = vmul.f32 -1.442695, %v980_v21  ;;  %v988_v22 = vrot.slane %v980_v21, 1  ;;  %v999_v24 = vrot.slane %v980_v21, 3  ;;  %v996_v27 = vrot.slane %v980_v21, 2 }
 0x230   :  { %v4610_v21 = vld [vmem:[%s5043_s2 + $0xc] ss:$16 sps:$4 sm:$0xff]  }
 0x231   :  { %4005 = vpow2.f32 %v3490_v34  ;;  %v3491_v23 = vmul.f32 -1.442695, %v988_v22  ;;  %v3492_v25 = vmul.f32 -1.442695, %v999_v24  ;;  %v4615_v34 = vld [vmem:[%s5043_s2] ss:$16 sps:$4 sm:$0xff]  }
 0x232   :  { %v4620_v22 = vld [vmem:[%s5043_s2 + $0x8] ss:$16 sps:$4 sm:$0xff]   ;;  %v4634_v24 = vld [vmem:[%s5043_s2 + $0x24] ss:$16 sps:$4 sm:$0xff]  }
 0x233   :  { %4007 = vpow2.f32 %v3491_v23  ;;  %v4629_v23 = vld [vmem:[%s5043_s2 + $0x20] ss:$16 sps:$4 sm:$0xff]  }
 0x234   :  { %4009 = vpow2.f32 %v3492_v25  ;;  %v4639_v25 = vld [vmem:[%s5043_s2 + $0x28] ss:$16 sps:$4 sm:$0xff]  }
 0x23b   :  { %v4006_v26 = vpop.eup %4005 }
 0x23c   :  { %v984_v28 = vadd.f32 1.0, %v4006_v26  ;;  %v4644_v26 = vld [vmem:[%s5043_s2 + $0x2c] ss:$16 sps:$4 sm:$0xff]  }
 0x23d   :  { %v4008_v30 = vpop.eup %4007 }
 0x23e   :  { %4011 = vrcp.f32 %v984_v28  ;;  %v993_v31 = vadd.f32 1.0, %v4008_v30  ;;  %v4010_v32 = vpop.eup %4009  ;;  %v4655_v28 = vld [vmem:[%s5043_s2 + $0x4c] ss:$16 sps:$4 sm:$0xff]   ;;  %v4663_v30 = vld [vmem:[%s5043_s2 + $0x40] ss:$16 sps:$4 sm:$0xff]  }
 0x23f   :  { %4013 = vtanh.f32 %v996_v27  ;;  %v1004_v7 = vadd.f32 1.0, %v4010_v32  ;;  %v4649_v27 = vld [vmem:[%s5043_s2 + $0x44] ss:$16 sps:$4 sm:$0xff]  }
 0x240   :  { %4015 = vrcp.f32 %v993_v31  ;;  %v4668_v31 = vld [vmem:[%s5043_s2 + $0x48] ss:$16 sps:$4 sm:$0xff]   ;;  %v4675_v32 = vld [vmem:[%s5043_s2 + $0x64] ss:$16 sps:$4 sm:$0xff]  }
 0x241   :  { %4017 = vrcp.f32 %v1004_v7  ;;  %v4699_v7 = vld [vmem:[%s5043_s2 + $0x84] ss:$16 sps:$4 sm:$0xff]  }
 0x248   :  { %v4012_v3 = vpop.eup %4011 }
 0x249   :  { %v4014_v5 = vpop.eup %4013 }
 0x24a   :  { %v4016_v6 = vpop.eup %4015  ;;  %v1008_v9 = vmul.f32 %v4014_v5, %v4012_v3  ;;  %v4680_v3 = vld [vmem:[%s5043_s2 + $0x6c] ss:$16 sps:$4 sm:$0xff]   ;;  %v4687_v5 = vld [vmem:[%s5043_s2 + $0x60] ss:$16 sps:$4 sm:$0xff]  }
 0x24b   :  { %v1007_v8 = vmul.f32 %v4016_v6, %v4517_v35  ;;  %v4018_v11 = vpop.eup %4017  ;;  %v4692_v6 = vld [vmem:[%s5043_s2 + $0x68] ss:$16 sps:$4 sm:$0xff]  }
 0x24d   :  { %v4558_v10 = vadd.f32 %v1008_v9, %v1007_v8  ;;  %v4704_v8 = vld [vmem:[%s5043_s2 + $0x8c] ss:$16 sps:$4 sm:$0xff]   ;;  %v4711_v9 = vld [vmem:[%s5043_s2 + $0x80] ss:$16 sps:$4 sm:$0xff]  }
 0x24f   :  { %4019 = vtanh.f32 %v4558_v10 }
 0x259   :  { %v4020_v12 = vpop.eup %4019 }
 0x25a   :  { %v1011_v13 = vmul.f32 %v4020_v12, %v4018_v11  ;;  %v4723_v11 = vld [vmem:[%s5043_s2 + $0xa4] ss:$16 sps:$4 sm:$0xff]   ;;  %v4728_v12 = vld [vmem:[%s5043_s2 + $0xac] ss:$16 sps:$4 sm:$0xff]  }
 0x25c   :  { %1012 = vst [vmem:[#allocation2 + $0x1] sm:$0x1] %v1011_v13  ;;  %v1015_v14 = vpack.c.bf16 %v1011_v13, %v1011_v13  ;;  %v4735_v13 = vld [vmem:[%s5043_s2 + $0xa0] ss:$16 sps:$4 sm:$0xff]  }
 0x25e   :  { %1241 = vmatmul.mubr.bf16.vlgmr.msra.gmra.mrb[12].mxu0 %v1015_v14  ;;  %1282 = vmatmul.mubr.bf16.vlgmr.msra.gmra.mrb[12].mxu1 %v1015_v14  ;;  %v4740_v14 = vld [vmem:[%s5043_s2 + $0xa8] ss:$16 sps:$4 sm:$0xff]  }
 0x25f   :  { %1548 = vmatpush1.bf16.msra.mxu0 %v4290_v36  ;;  %1589 = vmatpush1.bf16.msra.mxu1 %v4295_v37 }
 0x260   :  { %1549 = vmatprep.subr.bf16.mxu0 %v4302_v38  ;;  %1590 = vmatprep.subr.bf16.mxu1 %v4307_v39 }
 0x261   :  { %1579 = vmatprep.mubr.bf16.mxu0 %v4117_v1  ;;  %1620 = vmatprep.mubr.bf16.mxu1 %v4117_v1 }
 0x263   :  { %1550 = vmatpush1.bf16.msra.mxu0 %v4312_v40  ;;  %1591 = vmatpush1.bf16.msra.mxu1 %v4319_v41 }
 0x264   :  { %1551 = vmatprep.subr.bf16.mxu0 %v4326_v42  ;;  %1592 = vmatprep.subr.bf16.mxu1 %v4331_v43 }
 0x267   :  { %1552 = vmatpush1.bf16.msra.mxu0 %v4338_v44  ;;  %1593 = vmatpush1.bf16.msra.mxu1 %v4345_v45 }
 0x268   :  { %1553 = vmatprep.subr.bf16.mxu0 %v4352_v46  ;;  %1594 = vmatprep.subr.bf16.mxu1 %v4357_v47 }
 0x26b   :  { %1554 = vmatpush1.bf16.msra.mxu0 %v4362_v48  ;;  %1595 = vmatpush1.bf16.msra.mxu1 %v4367_v49 }
 0x26c   :  { %1555 = vmatprep.subr.bf16.mxu0 %v4372_v50  ;;  %1596 = vmatprep.subr.bf16.mxu1 %v4377_v51  ;;  %v1014_v50 = vld [vmem:[#allocation3 + $0x2] ss:$8 sm:$0xf] }
 0x26f   :  { %1556 = vmatpush1.bf16.msra.mxu0 %v4386_v52  ;;  %1597 = vmatpush1.bf16.msra.mxu1 %v4391_v53 }
 0x270   :  { %1557 = vmatprep.subr.bf16.mxu0 %v4396_v54  ;;  %1598 = vmatprep.subr.bf16.mxu1 %v4401_v55 }
 0x273   :  { %1558 = vmatpush1.bf16.msra.mxu0 %v4410_v56  ;;  %1599 = vmatpush1.bf16.msra.mxu1 %v4415_v57 }
 0x274   :  { %1559 = vmatprep.subr.bf16.mxu0 %v4420_v58  ;;  %1600 = vmatprep.subr.bf16.mxu1 %v4425_v59 }
 0x277   :  { %1560 = vmatpush1.bf16.msra.mxu0 %v4436_v60  ;;  %1601 = vmatpush1.bf16.msra.mxu1 %v4441_v61 }
 0x278   :  { %1561 = vmatprep.subr.bf16.mxu0 %v4448_v62  ;;  %1602 = vmatprep.subr.bf16.mxu1 %v4453_v63 }
 0x27b   :  { %1562 = vmatpush1.bf16.msra.mxu0 %v4460_v0  ;;  %1603 = vmatpush1.bf16.msra.mxu1 %v4465_v2 }
 0x27c   :  { %1886 = vmatprep.subr.bf16.mxu0 %v4605_v33  ;;  %1927 = vmatprep.subr.bf16.mxu1 %v4610_v21 }
 0x331   :  { %v1242_v36 = vpop.f32.mrb[12].mxu0  ;;  %v1283_v37 = vpop.f32.mrb[12].mxu1 }
 0x332   :  { %v1244_v38 = vpop.f32.mrb[13].mxu0  ;;  %v1285_v39 = vpop.f32.mrb[13].mxu1 }
 0x333   :  { %v1294_v40 = vcombine.low %v1242_v36, %v1244_v38  ;;  %v1295_v41 = vcombine.low %v1283_v37, %v1285_v39  ;;  %v1246_v42 = vpop.f32.mrb[14].mxu0  ;;  %v1287_v43 = vpop.f32.mrb[14].mxu1  ;;  %v4747_v36 = vld [vmem:[%s5043_s2 + $0xc4] ss:$16 sps:$4 sm:$0xff]   ;;  %v4752_v37 = vld [vmem:[%s5043_s2 + $0xcc] ss:$16 sps:$4 sm:$0xff]  }
 0x334   :  { %v1247_v44 = vpop.f32.mrb[15].mxu0  ;;  %v1288_v45 = vpop.f32.mrb[15].mxu1  ;;  %v4759_v38 = vld [vmem:[%s5043_s2 + $0xc0] ss:$16 sps:$4 sm:$0xff]   ;;  %v4764_v39 = vld [vmem:[%s5043_s2 + $0xc8] ss:$16 sps:$4 sm:$0xff]  }
 0x335   :  { %v1302_v46 = vrot.slane %v1294_v40, %v4512_v29  ;;  %v1309_v47 = vrot.slane %v1295_v41, %v4512_v29  ;;  %v4771_v40 = vld [vmem:[%s5043_s2 + $0xe4] ss:$16 sps:$4 sm:$0xff]   ;;  %v4776_v41 = vld [vmem:[%s5043_s2 + $0xec] ss:$16 sps:$4 sm:$0xff]   ;;  %v4783_v42 = vld [vmem:[%s5043_s2 + $0xe0] ss:$16 sps:$4 sm:$0xff]  }
 0x336   :  { %v4788_v43 = vld [vmem:[%s5043_s2 + $0xe8] ss:$16 sps:$4 sm:$0xff]  }
 0x337   :  { %v1310_v48 = vcombine.low %v1302_v46, %v1309_v47 }
 0x339   :  { %v1317_v49 = vrot.slane %v1310_v48, %v4512_v29 }
 0x33b   :  { %v1319_v51 = vadd.f32 %v1317_v49, %v1014_v50 }
 0x33d   :  { %v3525_v52 = vmul.f32 -1.442695, %v1319_v51  ;;  %v1327_v53 = vrot.slane %v1319_v51, 1  ;;  %v1338_v55 = vrot.slane %v1319_v51, 3  ;;  %v1335_v58 = vrot.slane %v1319_v51, 2 }
 0x33f   :  { %4021 = vpow2.f32 %v3525_v52  ;;  %v3526_v54 = vmul.f32 -1.442695, %v1327_v53  ;;  %v3527_v56 = vmul.f32 -1.442695, %v1338_v55 }
 0x341   :  { %4023 = vpow2.f32 %v3526_v54 }
 0x342   :  { %4025 = vpow2.f32 %v3527_v56 }
 0x349   :  { %v4022_v57 = vpop.eup %4021 }
 0x34a   :  { %v1323_v59 = vadd.f32 1.0, %v4022_v57 }
 0x34b   :  { %v4024_v60 = vpop.eup %4023 }
 0x34c   :  { %4027 = vrcp.f32 %v1323_v59  ;;  %v1332_v61 = vadd.f32 1.0, %v4024_v60  ;;  %v4026_v62 = vpop.eup %4025 }
 0x34d   :  { %4029 = vtanh.f32 %v1335_v58  ;;  %v1343_v35 = vadd.f32 1.0, %v4026_v62  ;;  %v1353_v58 = vld [vmem:[#allocation3 + $0x3] ss:$8 sm:$0xf] }
 0x34e   :  { %4031 = vrcp.f32 %v1332_v61 }
 0x34f   :  { %4033 = vrcp.f32 %v1343_v35 }
 0x356   :  { %v4028_v63 = vpop.eup %4027 }
 0x357   :  { %v4030_v0 = vpop.eup %4029 }
 0x358   :  { %v4032_v2 = vpop.eup %4031  ;;  %v1347_v15 = vmul.f32 %v4030_v0, %v4028_v63 }
 0x359   :  { %v1346_v4 = vmul.f32 %v4032_v2, %v4558_v10  ;;  %v4034_v17 = vpop.eup %4033  ;;  %v4716_v10 = vld [vmem:[%s5043_s2 + $0x88] ss:$16 sps:$4 sm:$0xff]  }
 0x35b   :  { %v4597_v16 = vadd.f32 %v1347_v15, %v1346_v4 }
 0x35d   :  { %4035 = vtanh.f32 %v4597_v16 }
 0x367   :  { %v4036_v18 = vpop.eup %4035 }
 0x368   :  { %v1350_v19 = vmul.f32 %v4036_v18, %v4034_v17 }
 0x36a   :  { %1351 = vst [vmem:[#allocation2 + $0x2] sm:$0x1] %v1350_v19  ;;  %v1354_v20 = vpack.c.bf16 %v1350_v19, %v1350_v19 }
 0x36c   :  { %1580 = vmatmul.mubr.bf16.vlgmr.msra.gmra.mrb[16].mxu0 %v1354_v20  ;;  %1621 = vmatmul.mubr.bf16.vlgmr.msra.gmra.mrb[16].mxu1 %v1354_v20 }
 0x36d   :  { %1918 = vmatprep.mubr.bf16.mxu0 %v4117_v1  ;;  %1959 = vmatprep.mubr.bf16.mxu1 %v4117_v1 }
 0x36e   :  { %1887 = vmatpush1.bf16.msra.mxu0 %v4615_v34  ;;  %1928 = vmatpush1.bf16.msra.mxu1 %v4620_v22 }
 0x36f   :  { %1888 = vmatprep.subr.bf16.mxu0 %v4634_v24  ;;  %1929 = vmatprep.subr.bf16.mxu1 %v4644_v26 }
 0x372   :  { %1889 = vmatpush1.bf16.msra.mxu0 %v4629_v23  ;;  %1930 = vmatpush1.bf16.msra.mxu1 %v4639_v25 }
 0x373   :  { %1890 = vmatprep.subr.bf16.mxu0 %v4649_v27  ;;  %1931 = vmatprep.subr.bf16.mxu1 %v4655_v28 }
 0x376   :  { %1891 = vmatpush1.bf16.msra.mxu0 %v4663_v30  ;;  %1932 = vmatpush1.bf16.msra.mxu1 %v4668_v31 }
 0x377   :  { %1892 = vmatprep.subr.bf16.mxu0 %v4675_v32  ;;  %1933 = vmatprep.subr.bf16.mxu1 %v4680_v3 }
 0x37a   :  { %1893 = vmatpush1.bf16.msra.mxu0 %v4687_v5  ;;  %1934 = vmatpush1.bf16.msra.mxu1 %v4692_v6 }
 0x37b   :  { %1894 = vmatprep.subr.bf16.mxu0 %v4699_v7  ;;  %1935 = vmatprep.subr.bf16.mxu1 %v4704_v8 }
 0x37e   :  { %1895 = vmatpush1.bf16.msra.mxu0 %v4711_v9  ;;  %1936 = vmatpush1.bf16.msra.mxu1 %v4716_v10 }
 0x37f   :  { %1896 = vmatprep.subr.bf16.mxu0 %v4723_v11  ;;  %1937 = vmatprep.subr.bf16.mxu1 %v4728_v12 }
 0x382   :  { %1897 = vmatpush1.bf16.msra.mxu0 %v4735_v13  ;;  %1938 = vmatpush1.bf16.msra.mxu1 %v4740_v14 }
 0x383   :  { %1898 = vmatprep.subr.bf16.mxu0 %v4747_v36  ;;  %1939 = vmatprep.subr.bf16.mxu1 %v4752_v37 }
 0x386   :  { %1899 = vmatpush1.bf16.msra.mxu0 %v4759_v38  ;;  %1940 = vmatpush1.bf16.msra.mxu1 %v4764_v39 }
 0x387   :  { %1900 = vmatprep.subr.bf16.mxu0 %v4771_v40  ;;  %1941 = vmatprep.subr.bf16.mxu1 %v4776_v41 }
 0x38a   :  { %1901 = vmatpush1.bf16.msra.mxu0 %v4783_v42  ;;  %1942 = vmatpush1.bf16.msra.mxu1 %v4788_v43 }
 0x38b   :  { %2225 = vmatprep.subr.bf16.mxu0 %v4605_v33  ;;  %2266 = vmatprep.subr.bf16.mxu1 %v4610_v21 }
 0x43f   :  { %v1581_v44 = vpop.f32.mrb[16].mxu0  ;;  %v1622_v45 = vpop.f32.mrb[16].mxu1 }
 0x440   :  { %v1583_v46 = vpop.f32.mrb[17].mxu0  ;;  %v1624_v47 = vpop.f32.mrb[17].mxu1 }
 0x441   :  { %v1633_v48 = vcombine.low %v1581_v44, %v1583_v46  ;;  %v1634_v49 = vcombine.low %v1622_v45, %v1624_v47  ;;  %v1585_v50 = vpop.f32.mrb[18].mxu0  ;;  %v1626_v51 = vpop.f32.mrb[18].mxu1 }
 0x442   :  { %v1586_v52 = vpop.f32.mrb[19].mxu0  ;;  %v1627_v53 = vpop.f32.mrb[19].mxu1 }
 0x443   :  { %v1641_v54 = vrot.slane %v1633_v48, %v4512_v29  ;;  %v1648_v55 = vrot.slane %v1634_v49, %v4512_v29 }
 0x445   :  { %v1649_v56 = vcombine.low %v1641_v54, %v1648_v55 }
 0x447   :  { %v1656_v57 = vrot.slane %v1649_v56, %v4512_v29 }
 0x449   :  { %v1658_v59 = vadd.f32 %v1656_v57, %v1353_v58 }
 0x44b   :  { %v3560_v60 = vmul.f32 -1.442695, %v1658_v59  ;;  %v1666_v61 = vrot.slane %v1658_v59, 1  ;;  %v1677_v63 = vrot.slane %v1658_v59, 3  ;;  %v1674_v35 = vrot.slane %v1658_v59, 2 }
 0x44d   :  { %4037 = vpow2.f32 %v3560_v60  ;;  %v3561_v62 = vmul.f32 -1.442695, %v1666_v61  ;;  %v3562_v0 = vmul.f32 -1.442695, %v1677_v63 }
 0x44f   :  { %4039 = vpow2.f32 %v3561_v62 }
 0x450   :  { %4041 = vpow2.f32 %v3562_v0 }
 0x457   :  { %v4038_v2 = vpop.eup %4037 }
 0x458   :  { %v1662_v4 = vadd.f32 1.0, %v4038_v2 }
 0x459   :  { %v4040_v15 = vpop.eup %4039 }
 0x45a   :  { %4043 = vrcp.f32 %v1662_v4  ;;  %v1671_v17 = vadd.f32 1.0, %v4040_v15  ;;  %v4042_v18 = vpop.eup %4041 }
 0x45b   :  { %4045 = vtanh.f32 %v1674_v35  ;;  %v1682_v45 = vadd.f32 1.0, %v4042_v18  ;;  %v1692_v35 = vld [vmem:[#allocation3 + $0x4] ss:$8 sm:$0xf] }
 0x45c   :  { %4047 = vrcp.f32 %v1671_v17 }
 0x45d   :  { %4049 = vrcp.f32 %v1682_v45 }
 0x464   :  { %v4044_v19 = vpop.eup %4043 }
 0x465   :  { %v4046_v20 = vpop.eup %4045 }
 0x466   :  { %v4048_v44 = vpop.eup %4047  ;;  %v1686_v47 = vmul.f32 %v4046_v20, %v4044_v19 }
 0x467   :  { %v1685_v46 = vmul.f32 %v4048_v44, %v4597_v16  ;;  %v4050_v49 = vpop.eup %4049 }
 0x469   :  { %v4800_v48 = vadd.f32 %v1686_v47, %v1685_v46 }
 0x46b   :  { %4051 = vtanh.f32 %v4800_v48 }
 0x475   :  { %v4052_v50 = vpop.eup %4051 }
 0x476   :  { %v1689_v51 = vmul.f32 %v4052_v50, %v4050_v49 }
 0x478   :  { %1690 = vst [vmem:[#allocation2 + $0x3] sm:$0x1] %v1689_v51  ;;  %v1693_v52 = vpack.c.bf16 %v1689_v51, %v1689_v51 }
 0x47a   :  { %1919 = vmatmul.mubr.bf16.vlgmr.msra.gmra.mrb[20].mxu0 %v1693_v52  ;;  %1960 = vmatmul.mubr.bf16.vlgmr.msra.gmra.mrb[20].mxu1 %v1693_v52 }
 0x47b   :  { %2226 = vmatpush1.bf16.msra.mxu0 %v4615_v34  ;;  %2267 = vmatpush1.bf16.msra.mxu1 %v4620_v22 }
 0x47c   :  { %2227 = vmatprep.subr.bf16.mxu0 %v4634_v24  ;;  %2268 = vmatprep.subr.bf16.mxu1 %v4644_v26 }
 0x47d   :  { %2257 = vmatprep.mubr.bf16.mxu0 %v4117_v1  ;;  %2298 = vmatprep.mubr.bf16.mxu1 %v4117_v1 }
 0x47f   :  { %2228 = vmatpush1.bf16.msra.mxu0 %v4629_v23  ;;  %2269 = vmatpush1.bf16.msra.mxu1 %v4639_v25 }
 0x480   :  { %2229 = vmatprep.subr.bf16.mxu0 %v4649_v27  ;;  %2270 = vmatprep.subr.bf16.mxu1 %v4655_v28 }
 0x483   :  { %2230 = vmatpush1.bf16.msra.mxu0 %v4663_v30  ;;  %2271 = vmatpush1.bf16.msra.mxu1 %v4668_v31 }
 0x484   :  { %2231 = vmatprep.subr.bf16.mxu0 %v4675_v32  ;;  %2272 = vmatprep.subr.bf16.mxu1 %v4680_v3 }
 0x487   :  { %2232 = vmatpush1.bf16.msra.mxu0 %v4687_v5  ;;  %2273 = vmatpush1.bf16.msra.mxu1 %v4692_v6 }
 0x488   :  { %2233 = vmatprep.subr.bf16.mxu0 %v4699_v7  ;;  %2274 = vmatprep.subr.bf16.mxu1 %v4704_v8 }
 0x48b   :  { %2234 = vmatpush1.bf16.msra.mxu0 %v4711_v9  ;;  %2275 = vmatpush1.bf16.msra.mxu1 %v4716_v10 }
 0x48c   :  { %2235 = vmatprep.subr.bf16.mxu0 %v4723_v11  ;;  %2276 = vmatprep.subr.bf16.mxu1 %v4728_v12 }
 0x48f   :  { %2236 = vmatpush1.bf16.msra.mxu0 %v4735_v13  ;;  %2277 = vmatpush1.bf16.msra.mxu1 %v4740_v14 }
 0x490   :  { %2237 = vmatprep.subr.bf16.mxu0 %v4747_v36  ;;  %2278 = vmatprep.subr.bf16.mxu1 %v4752_v37 }
 0x493   :  { %2238 = vmatpush1.bf16.msra.mxu0 %v4759_v38  ;;  %2279 = vmatpush1.bf16.msra.mxu1 %v4764_v39 }
 0x494   :  { %2239 = vmatprep.subr.bf16.mxu0 %v4771_v40  ;;  %2280 = vmatprep.subr.bf16.mxu1 %v4776_v41 }
 0x497   :  { %2240 = vmatpush1.bf16.msra.mxu0 %v4783_v42  ;;  %2281 = vmatpush1.bf16.msra.mxu1 %v4788_v43 }
 0x498   :  { %2564 = vmatprep.subr.bf16.mxu0 %v4605_v33  ;;  %2605 = vmatprep.subr.bf16.mxu1 %v4610_v21 }
 0x54d   :  { %v1920_v16 = vpop.f32.mrb[20].mxu0  ;;  %v1961_v53 = vpop.f32.mrb[20].mxu1 }
 0x54e   :  { %v1922_v54 = vpop.f32.mrb[21].mxu0  ;;  %v1963_v55 = vpop.f32.mrb[21].mxu1 }
 0x54f   :  { %v1972_v56 = vcombine.low %v1920_v16, %v1922_v54  ;;  %v1973_v57 = vcombine.low %v1961_v53, %v1963_v55  ;;  %v1924_v58 = vpop.f32.mrb[22].mxu0  ;;  %v1965_v59 = vpop.f32.mrb[22].mxu1 }
 0x550   :  { %v1925_v60 = vpop.f32.mrb[23].mxu0  ;;  %v1966_v61 = vpop.f32.mrb[23].mxu1 }
 0x551   :  { %v1980_v62 = vrot.slane %v1972_v56, %v4512_v29  ;;  %v1987_v63 = vrot.slane %v1973_v57, %v4512_v29 }
 0x553   :  { %v1988_v0 = vcombine.low %v1980_v62, %v1987_v63 }
 0x555   :  { %v1995_v2 = vrot.slane %v1988_v0, %v4512_v29 }
 0x557   :  { %v1997_v4 = vadd.f32 %v1995_v2, %v1692_v35 }
 0x559   :  { %v3595_v15 = vmul.f32 -1.442695, %v1997_v4  ;;  %v2005_v17 = vrot.slane %v1997_v4, 1  ;;  %v2016_v19 = vrot.slane %v1997_v4, 3  ;;  %v2013_v45 = vrot.slane %v1997_v4, 2 }
 0x55b   :  { %4053 = vpow2.f32 %v3595_v15  ;;  %v3596_v18 = vmul.f32 -1.442695, %v2005_v17  ;;  %v3597_v20 = vmul.f32 -1.442695, %v2016_v19 }
 0x55d   :  { %4055 = vpow2.f32 %v3596_v18 }
 0x55e   :  { %4057 = vpow2.f32 %v3597_v20 }
 0x565   :  { %v4054_v44 = vpop.eup %4053 }
 0x566   :  { %v2001_v46 = vadd.f32 1.0, %v4054_v44 }
 0x567   :  { %v4056_v47 = vpop.eup %4055 }
 0x568   :  { %4059 = vrcp.f32 %v2001_v46  ;;  %v2010_v49 = vadd.f32 1.0, %v4056_v47  ;;  %v4058_v50 = vpop.eup %4057 }
 0x569   :  { %4061 = vtanh.f32 %v2013_v45  ;;  %v2021_v53 = vadd.f32 1.0, %v4058_v50 }
 0x56a   :  { %4063 = vrcp.f32 %v2010_v49 }
 0x56b   :  { %4065 = vrcp.f32 %v2021_v53 }
 0x572   :  { %v4060_v51 = vpop.eup %4059 }
 0x573   :  { %v4062_v52 = vpop.eup %4061 }
 0x574   :  { %v4064_v16 = vpop.eup %4063  ;;  %v2025_v55 = vmul.f32 %v4062_v52, %v4060_v51 }
 0x575   :  { %v2024_v54 = vmul.f32 %v4064_v16, %v4800_v48  ;;  %v4066_v57 = vpop.eup %4065 }
 0x577   :  { %v4841_v56 = vadd.f32 %v2025_v55, %v2024_v54 }
 0x579   :  { %4067 = vtanh.f32 %v4841_v56 }
 0x583   :  { %v4068_v58 = vpop.eup %4067 }
 0x584   :  { %v2028_v59 = vmul.f32 %v4068_v58, %v4066_v57 }
 0x586   :  { %2029 = vst [vmem:[#allocation2 + $0x4] sm:$0x1] %v2028_v59  ;;  %v2032_v60 = vpack.c.bf16 %v2028_v59, %v2028_v59 }
 0x588   :  { %2258 = vmatmul.mubr.bf16.vlgmr.msra.gmra.mrb[24].mxu0 %v2032_v60  ;;  %2299 = vmatmul.mubr.bf16.vlgmr.msra.gmra.mrb[24].mxu1 %v2032_v60 }
 0x589   :  { %2565 = vmatpush1.bf16.msra.mxu0 %v4615_v34  ;;  %2606 = vmatpush1.bf16.msra.mxu1 %v4620_v22 }
 0x58a   :  { %2566 = vmatprep.subr.bf16.mxu0 %v4634_v24  ;;  %2607 = vmatprep.subr.bf16.mxu1 %v4644_v26 }
 0x58b   :  { %2596 = vmatprep.mubr.bf16.mxu0 %v4117_v1  ;;  %2637 = vmatprep.mubr.bf16.mxu1 %v4117_v1 }
 0x58d   :  { %2567 = vmatpush1.bf16.msra.mxu0 %v4629_v23  ;;  %2608 = vmatpush1.bf16.msra.mxu1 %v4639_v25 }
 0x58e   :  { %2568 = vmatprep.subr.bf16.mxu0 %v4649_v27  ;;  %2609 = vmatprep.subr.bf16.mxu1 %v4655_v28 }
 0x591   :  { %2569 = vmatpush1.bf16.msra.mxu0 %v4663_v30  ;;  %2610 = vmatpush1.bf16.msra.mxu1 %v4668_v31 }
 0x592   :  { %2570 = vmatprep.subr.bf16.mxu0 %v4675_v32  ;;  %2611 = vmatprep.subr.bf16.mxu1 %v4680_v3 }
 0x595   :  { %2571 = vmatpush1.bf16.msra.mxu0 %v4687_v5  ;;  %2612 = vmatpush1.bf16.msra.mxu1 %v4692_v6 }
 0x596   :  { %2572 = vmatprep.subr.bf16.mxu0 %v4699_v7  ;;  %2613 = vmatprep.subr.bf16.mxu1 %v4704_v8 }
 0x599   :  { %2573 = vmatpush1.bf16.msra.mxu0 %v4711_v9  ;;  %2614 = vmatpush1.bf16.msra.mxu1 %v4716_v10 }
 0x59a   :  { %2574 = vmatprep.subr.bf16.mxu0 %v4723_v11  ;;  %2615 = vmatprep.subr.bf16.mxu1 %v4728_v12 }
 0x59d   :  { %2575 = vmatpush1.bf16.msra.mxu0 %v4735_v13  ;;  %2616 = vmatpush1.bf16.msra.mxu1 %v4740_v14 }
 0x59e   :  { %2576 = vmatprep.subr.bf16.mxu0 %v4747_v36  ;;  %2617 = vmatprep.subr.bf16.mxu1 %v4752_v37 }
 0x5a1   :  { %2577 = vmatpush1.bf16.msra.mxu0 %v4759_v38  ;;  %2618 = vmatpush1.bf16.msra.mxu1 %v4764_v39 }
 0x5a2   :  { %2578 = vmatprep.subr.bf16.mxu0 %v4771_v40  ;;  %2619 = vmatprep.subr.bf16.mxu1 %v4776_v41 }
 0x5a5   :  { %2579 = vmatpush1.bf16.msra.mxu0 %v4783_v42  ;;  %2620 = vmatpush1.bf16.msra.mxu1 %v4788_v43 }
 0x5a6   :  { %2903 = vmatprep.subr.bf16.mxu0 %v4605_v33  ;;  %2944 = vmatprep.subr.bf16.mxu1 %v4610_v21  ;;  %v2031_v33 = vld [vmem:[#allocation3 + $0x5] ss:$8 sm:$0xf] }
 0x65b   :  { %v2259_v48 = vpop.f32.mrb[24].mxu0  ;;  %v2300_v61 = vpop.f32.mrb[24].mxu1 }
 0x65c   :  { %v2261_v62 = vpop.f32.mrb[25].mxu0  ;;  %v2302_v63 = vpop.f32.mrb[25].mxu1 }
 0x65d   :  { %v2311_v0 = vcombine.low %v2259_v48, %v2261_v62  ;;  %v2312_v2 = vcombine.low %v2300_v61, %v2302_v63  ;;  %v2263_v35 = vpop.f32.mrb[26].mxu0  ;;  %v2304_v4 = vpop.f32.mrb[26].mxu1 }
 0x65e   :  { %v2264_v15 = vpop.f32.mrb[27].mxu0  ;;  %v2305_v17 = vpop.f32.mrb[27].mxu1 }
 0x65f   :  { %v2319_v18 = vrot.slane %v2311_v0, %v4512_v29  ;;  %v2326_v19 = vrot.slane %v2312_v2, %v4512_v29 }
 0x661   :  { %v2327_v20 = vcombine.low %v2319_v18, %v2326_v19 }
 0x663   :  { %v2334_v44 = vrot.slane %v2327_v20, %v4512_v29 }
 0x665   :  { %v2336_v45 = vadd.f32 %v2334_v44, %v2031_v33  ;;  %v3965_v44 = vld [vmem:[%s5046_s4] sm:$0xff]   ;;  %v4119_v33 = vmov 0.0  }
 0x667   :  { %v3630_v21 = vmul.f32 -1.442695, %v2336_v45  ;;  %v2344_v46 = vrot.slane %v2336_v45, 1  ;;  %v2355_v49 = vrot.slane %v2336_v45, 3  ;;  %v2352_v52 = vrot.slane %v2336_v45, 2  ;;  %v3966_v45 = vld [vmem:[%s5046_s4 + $0x8] sm:$0xff]  }
 0x669   :  { %4069 = vpow2.f32 %v3630_v21  ;;  %v3631_v47 = vmul.f32 -1.442695, %v2344_v46  ;;  %v3632_v50 = vmul.f32 -1.442695, %v2355_v49  ;;  %v3967_v21 = vld [vmem:[%s5046_s4 + $0x10] sm:$0xff]   ;;  %v3968_v46 = vld [vmem:[%s5046_s4 + $0x18] sm:$0xff]  }
 0x66a   :  { %v3970_v49 = vld [vmem:[%s5046_s4 + $0x28] sm:$0xff]  }
 0x66b   :  { %4071 = vpow2.f32 %v3631_v47  ;;  %v3969_v47 = vld [vmem:[%s5046_s4 + $0x20] sm:$0xff]  }
 0x66c   :  { %4073 = vpow2.f32 %v3632_v50  ;;  %v3971_v50 = vld [vmem:[%s5046_s4 + $0x30] sm:$0xff]  }
 0x673   :  { %v4070_v51 = vpop.eup %4069 }
 0x674   :  { %v2340_v16 = vadd.f32 1.0, %v4070_v51  ;;  %v3972_v51 = vld [vmem:[%s5046_s4 + $0x38] sm:$0xff]  }
 0x675   :  { %v4072_v53 = vpop.eup %4071 }
 0x676   :  { %4075 = vrcp.f32 %v2340_v16  ;;  %v2349_v54 = vadd.f32 1.0, %v4072_v53  ;;  %v4074_v55 = vpop.eup %4073  ;;  %v3974_v16 = vld [vmem:[%s5047_s6 + $0x8] sm:$0xff]   ;;  %v3975_v53 = vld [vmem:[%s5047_s6 + $0x10] sm:$0xff]  }
 0x677   :  { %4077 = vtanh.f32 %v2352_v52  ;;  %v2360_v60 = vadd.f32 1.0, %v4074_v55  ;;  %v3973_v52 = vld [vmem:[%s5047_s6] sm:$0xff]  }
 0x678   :  { %4079 = vrcp.f32 %v2349_v54  ;;  %v3976_v54 = vld [vmem:[%s5047_s6 + $0x18] sm:$0xff]   ;;  %v3977_v55 = vld [vmem:[%s5047_s6 + $0x20] sm:$0xff]  }
 0x679   :  { %4081 = vrcp.f32 %v2360_v60 }
 0x680   :  { %v4076_v57 = vpop.eup %4075 }
 0x681   :  { %v4078_v58 = vpop.eup %4077 }
 0x682   :  { %v4080_v59 = vpop.eup %4079  ;;  %v2364_v61 = vmul.f32 %v4078_v58, %v4076_v57  ;;  %v3978_v57 = vld [vmem:[%s5047_s6 + $0x28] sm:$0xff]  }
 0x683   :  { %v2363_v48 = vmul.f32 %v4080_v59, %v4841_v56  ;;  %v4082_v63 = vpop.eup %4081 }
 0x685   :  { %v4882_v62 = vadd.f32 %v2364_v61, %v2363_v48 }
 0x687   :  { %4083 = vtanh.f32 %v4882_v62 }
 0x691   :  { %v4084_v0 = vpop.eup %4083 }
 0x692   :  { %v2367_v2 = vmul.f32 %v4084_v0, %v4082_v63 }
 0x694   :  { %2368 = vst [vmem:[#allocation2 + $0x5] sm:$0x1] %v2367_v2  ;;  %v2371_v35 = vpack.c.bf16 %v2367_v2, %v2367_v2 }
 0x696   :  { %2597 = vmatmul.mubr.bf16.vlgmr.msra.gmra.mrb[28].mxu0 %v2371_v35  ;;  %2638 = vmatmul.mubr.bf16.vlgmr.msra.gmra.mrb[28].mxu1 %v2371_v35 }
 0x697   :  { %2904 = vmatpush1.bf16.msra.mxu0 %v4615_v34  ;;  %2945 = vmatpush1.bf16.msra.mxu1 %v4620_v22 }
 0x698   :  { %2905 = vmatprep.subr.bf16.mxu0 %v4634_v24  ;;  %2946 = vmatprep.subr.bf16.mxu1 %v4644_v26 }
 0x699   :  { %2935 = vmatprep.mubr.bf16.mxu0 %v4117_v1  ;;  %2976 = vmatprep.mubr.bf16.mxu1 %v4117_v1 }
 0x69b   :  { %2906 = vmatpush1.bf16.msra.mxu0 %v4629_v23  ;;  %2947 = vmatpush1.bf16.msra.mxu1 %v4639_v25 }
 0x69c   :  { %2907 = vmatprep.subr.bf16.mxu0 %v4649_v27  ;;  %2948 = vmatprep.subr.bf16.mxu1 %v4655_v28 }
 0x69f   :  { %2908 = vmatpush1.bf16.msra.mxu0 %v4663_v30  ;;  %2949 = vmatpush1.bf16.msra.mxu1 %v4668_v31 }
 0x6a0   :  { %2909 = vmatprep.subr.bf16.mxu0 %v4675_v32  ;;  %2950 = vmatprep.subr.bf16.mxu1 %v4680_v3 }
 0x6a3   :  { %2910 = vmatpush1.bf16.msra.mxu0 %v4687_v5  ;;  %2951 = vmatpush1.bf16.msra.mxu1 %v4692_v6  ;;  %v2370_v6 = vld [vmem:[#allocation3 + $0x6] ss:$8 sm:$0xf] }
 0x6a4   :  { %2911 = vmatprep.subr.bf16.mxu0 %v4699_v7  ;;  %2952 = vmatprep.subr.bf16.mxu1 %v4704_v8 }
 0x6a7   :  { %2912 = vmatpush1.bf16.msra.mxu0 %v4711_v9  ;;  %2953 = vmatpush1.bf16.msra.mxu1 %v4716_v10 }
 0x6a8   :  { %2913 = vmatprep.subr.bf16.mxu0 %v4723_v11  ;;  %2954 = vmatprep.subr.bf16.mxu1 %v4728_v12 }
 0x6ab   :  { %2914 = vmatpush1.bf16.msra.mxu0 %v4735_v13  ;;  %2955 = vmatpush1.bf16.msra.mxu1 %v4740_v14 }
 0x6ac   :  { %2915 = vmatprep.subr.bf16.mxu0 %v4747_v36  ;;  %2956 = vmatprep.subr.bf16.mxu1 %v4752_v37 }
 0x6af   :  { %2916 = vmatpush1.bf16.msra.mxu0 %v4759_v38  ;;  %2957 = vmatpush1.bf16.msra.mxu1 %v4764_v39 }
 0x6b0   :  { %2917 = vmatprep.subr.bf16.mxu0 %v4771_v40  ;;  %2958 = vmatprep.subr.bf16.mxu1 %v4776_v41 }
 0x6b3   :  { %2918 = vmatpush1.bf16.msra.mxu0 %v4783_v42  ;;  %2959 = vmatpush1.bf16.msra.mxu1 %v4788_v43 }
 0x6b4   :  { %3757 = vmatprep.subr.bf16.mxu0 %v4119_v33  ;;  %3777 = vmatprep.subr.bf16.mxu1 %v4119_v33 }
 0x769   :  { %v2598_v1 = vpop.f32.mrb[28].mxu0  ;;  %v2639_v34 = vpop.f32.mrb[28].mxu1 }
 0x76a   :  { %v2600_v22 = vpop.f32.mrb[29].mxu0  ;;  %v2641_v23 = vpop.f32.mrb[29].mxu1 }
 0x76b   :  { %v2650_v24 = vcombine.low %v2598_v1, %v2600_v22  ;;  %v2651_v25 = vcombine.low %v2639_v34, %v2641_v23  ;;  %v2602_v26 = vpop.f32.mrb[30].mxu0  ;;  %v2643_v27 = vpop.f32.mrb[30].mxu1 }
 0x76c   :  { %v2603_v28 = vpop.f32.mrb[31].mxu0  ;;  %v2644_v30 = vpop.f32.mrb[31].mxu1 }
 0x76d   :  { %v2658_v31 = vrot.slane %v2650_v24, %v4512_v29  ;;  %v2665_v32 = vrot.slane %v2651_v25, %v4512_v29  ;;  %v2709_v24 = vld [vmem:[#allocation3 + $0x7] ss:$8 sm:$0xf] }
 0x76f   :  { %v2666_v3 = vcombine.low %v2658_v31, %v2665_v32 }
 0x771   :  { %v2673_v5 = vrot.slane %v2666_v3, %v4512_v29 }
 0x773   :  { %v2675_v7 = vadd.f32 %v2673_v5, %v2370_v6 }
 0x775   :  { %v3665_v8 = vmul.f32 -1.442695, %v2675_v7  ;;  %v2683_v9 = vrot.slane %v2675_v7, 1  ;;  %v2694_v11 = vrot.slane %v2675_v7, 3  ;;  %v2691_v14 = vrot.slane %v2675_v7, 2 }
 0x777   :  { %4085 = vpow2.f32 %v3665_v8  ;;  %v3666_v10 = vmul.f32 -1.442695, %v2683_v9  ;;  %v3667_v12 = vmul.f32 -1.442695, %v2694_v11 }
 0x779   :  { %4087 = vpow2.f32 %v3666_v10 }
 0x77a   :  { %4089 = vpow2.f32 %v3667_v12 }
 0x781   :  { %v4086_v13 = vpop.eup %4085 }
 0x782   :  { %v2679_v36 = vadd.f32 1.0, %v4086_v13 }
 0x783   :  { %v4088_v37 = vpop.eup %4087 }
 0x784   :  { %4091 = vrcp.f32 %v2679_v36  ;;  %v2688_v38 = vadd.f32 1.0, %v4088_v37  ;;  %v4090_v39 = vpop.eup %4089 }
 0x785   :  { %4093 = vtanh.f32 %v2691_v14  ;;  %v2699_v43 = vadd.f32 1.0, %v4090_v39 }
 0x786   :  { %4095 = vrcp.f32 %v2688_v38 }
 0x787   :  { %4097 = vrcp.f32 %v2699_v43  ;;  %v3981_v43 = vld [vmem:[%s5048_s8] sm:$0xff]  }
 0x78e   :  { %v4092_v40 = vpop.eup %4091 }
 0x78f   :  { %v4094_v41 = vpop.eup %4093 }
 0x790   :  { %v4096_v42 = vpop.eup %4095  ;;  %v2703_v4 = vmul.f32 %v4094_v41, %v4092_v40  ;;  %v3979_v41 = vld [vmem:[%s5047_s6 + $0x30] sm:$0xff]  }
 0x791   :  { %v2702_v56 = vmul.f32 %v4096_v42, %v4882_v62  ;;  %v4098_v17 = vpop.eup %4097  ;;  %v3980_v42 = vld [vmem:[%s5047_s6 + $0x38] sm:$0xff]  }
 0x793   :  { %v4921_v15 = vadd.f32 %v2703_v4, %v2702_v56  ;;  %v3982_v56 = vld [vmem:[%s5048_s8 + $0x8] sm:$0xff]   ;;  %v3983_v4 = vld [vmem:[%s5048_s8 + $0x10] sm:$0xff]  }
 0x795   :  { %4099 = vtanh.f32 %v4921_v15 }
 0x79f   :  { %v4100_v18 = vpop.eup %4099 }
 0x7a0   :  { %v2706_v19 = vmul.f32 %v4100_v18, %v4098_v17  ;;  %v3985_v17 = vld [vmem:[%s5048_s8 + $0x20] sm:$0xff]   ;;  %v3986_v18 = vld [vmem:[%s5048_s8 + $0x28] sm:$0xff]  }
 0x7a2   :  { %2707 = vst [vmem:[#allocation2 + $0x6] sm:$0x1] %v2706_v19  ;;  %v2710_v20 = vpack.c.bf16 %v2706_v19, %v2706_v19  ;;  %v3703_v19 = vld [vmem:[%s5049_s5] ss:$0 sm:$0xff] }
 0x7a4   :  { %2936 = vmatmul.mubr.bf16.vlgmr.msra.gmra.mrb[32].mxu0 %v2710_v20  ;;  %2977 = vmatmul.mubr.bf16.vlgmr.msra.gmra.mrb[32].mxu1 %v2710_v20 }
 0x7a5   :  { %3758 = vmatpush3.bf16.msra.mxu0 %v3965_v44  ;;  %3773 = vmatprep.mubr.msk.bf16.mxu0 %vm4120_vm0, %v4119_v33 }
 0x7a6   :  { %3759 = vmatprep.subr.bf16.mxu0 %v4119_v33  ;;  %3793 = vmatprep.mubr.msk.bf16.mxu1 %vm4120_vm0, %v4119_v33 }
 0x7a7   :  { %3778 = vmatpush3.bf16.msra.mxu1 %v3973_v52  ;;  %v3712_v52 = vld [vmem:[%s5050_s7] ss:$0 sm:$0xff] }
 0x7a8   :  { %3779 = vmatprep.subr.bf16.mxu1 %v4119_v33 }
 0x7a9   :  { %3760 = vmatpush3.bf16.msra.mxu0 %v3966_v45 }
 0x7aa   :  { %3761 = vmatprep.subr.bf16.mxu0 %v4119_v33 }
 0x7ab   :  { %3780 = vmatpush3.bf16.msra.mxu1 %v3974_v16 }
 0x7ac   :  { %3781 = vmatprep.subr.bf16.mxu1 %v4119_v33 }
 0x7ad   :  { %3762 = vmatpush3.bf16.msra.mxu0 %v3967_v21 }
 0x7ae   :  { %3763 = vmatprep.subr.bf16.mxu0 %v4119_v33 }
 0x7af   :  { %3782 = vmatpush3.bf16.msra.mxu1 %v3975_v53 }
 0x7b0   :  { %3783 = vmatprep.subr.bf16.mxu1 %v4119_v33 }
 0x7b1   :  { %3764 = vmatpush3.bf16.msra.mxu0 %v3968_v46 }
 0x7b2   :  { %3765 = vmatprep.subr.bf16.mxu0 %v4119_v33 }
 0x7b3   :  { %3784 = vmatpush3.bf16.msra.mxu1 %v3976_v54 }
 0x7b4   :  { %3785 = vmatprep.subr.bf16.mxu1 %v4119_v33 }
 0x7b5   :  { %3766 = vmatpush3.bf16.msra.mxu0 %v3969_v47 }
 0x7b6   :  { %3767 = vmatprep.subr.bf16.mxu0 %v4119_v33 }
 0x7b7   :  { %3786 = vmatpush3.bf16.msra.mxu1 %v3977_v55 }
 0x7b8   :  { %3787 = vmatprep.subr.bf16.mxu1 %v4119_v33 }
 0x7b9   :  { %3768 = vmatpush3.bf16.msra.mxu0 %v3970_v49 }
 0x7ba   :  { %3769 = vmatprep.subr.bf16.mxu0 %v4119_v33 }
 0x7bb   :  { %3788 = vmatpush3.bf16.msra.mxu1 %v3978_v57 }
 0x7bc   :  { %3789 = vmatprep.subr.bf16.mxu1 %v4119_v33 }
 0x7bd   :  { %3770 = vmatpush3.bf16.msra.mxu0 %v3971_v50  ;;  %v3987_v50 = vld [vmem:[%s5048_s8 + $0x30] sm:$0xff]  }
 0x7be   :  { %3771 = vmatprep.subr.bf16.mxu0 %v4119_v33 }
 0x7bf   :  { %3790 = vmatpush3.bf16.msra.mxu1 %v3979_v41 }
 0x7c0   :  { %3791 = vmatprep.subr.bf16.mxu1 %v4119_v33 }
 0x7c1   :  { %3772 = vmatpush3.bf16.msra.mxu0 %v3972_v51  ;;  %v3988_v51 = vld [vmem:[%s5048_s8 + $0x38] sm:$0xff]  }
 0x7c2   :  { %3797 = vmatprep.subr.bf16.mxu0 %v4119_v33 }
 0x7c3   :  { %3792 = vmatpush3.bf16.msra.mxu1 %v3980_v42 }
 0x877   :  { %v2937_v58 = vpop.f32.mrb[32].mxu0  ;;  %v2978_v59 = vpop.f32.mrb[32].mxu1 }
 0x878   :  { %v2939_v60 = vpop.f32.mrb[33].mxu0  ;;  %v2980_v48 = vpop.f32.mrb[33].mxu1 }
 0x879   :  { %v2989_v61 = vcombine.low %v2937_v58, %v2939_v60  ;;  %v2990_v62 = vcombine.low %v2978_v59, %v2980_v48  ;;  %v2941_v63 = vpop.f32.mrb[34].mxu0  ;;  %v2982_v0 = vpop.f32.mrb[34].mxu1 }
 0x87a   :  { %v2942_v2 = vpop.f32.mrb[35].mxu0  ;;  %v2983_v35 = vpop.f32.mrb[35].mxu1 }
 0x87b   :  { %v2997_v1 = vrot.slane %v2989_v61, %v4512_v29  ;;  %v3004_v34 = vrot.slane %v2990_v62, %v4512_v29 }
 0x87d   :  { %v3005_v22 = vcombine.low %v2997_v1, %v3004_v34 }
 0x87f   :  { %v3012_v23 = vrot.slane %v3005_v22, %v4512_v29 }
 0x881   :  { %v3014_v25 = vadd.f32 %v3012_v23, %v2709_v24 }
 0x883   :  { %v3700_v26 = vmul.f32 -1.442695, %v3014_v25  ;;  %v3022_v27 = vrot.slane %v3014_v25, 1  ;;  %v3033_v30 = vrot.slane %v3014_v25, 3  ;;  %v3030_v3 = vrot.slane %v3014_v25, 2 }
 0x885   :  { %4101 = vpow2.f32 %v3700_v26  ;;  %v3701_v28 = vmul.f32 -1.442695, %v3022_v27  ;;  %v3702_v31 = vmul.f32 -1.442695, %v3033_v30 }
 0x887   :  { %4103 = vpow2.f32 %v3701_v28 }
 0x888   :  { %4105 = vpow2.f32 %v3702_v31 }
 0x88f   :  { %v4102_v32 = vpop.eup %4101 }
 0x890   :  { %v3018_v5 = vadd.f32 1.0, %v4102_v32 }
 0x891   :  { %v4104_v6 = vpop.eup %4103 }
 0x892   :  { %4107 = vrcp.f32 %v3018_v5  ;;  %v3027_v7 = vadd.f32 1.0, %v4104_v6  ;;  %v4106_v8 = vpop.eup %4105 }
 0x893   :  { %4109 = vtanh.f32 %v3030_v3  ;;  %v3038_v11 = vadd.f32 1.0, %v4106_v8 }
 0x894   :  { %4111 = vrcp.f32 %v3027_v7 }
 0x895   :  { %4113 = vrcp.f32 %v3038_v11 }
 0x89c   :  { %v4108_v29 = vpop.eup %4107 }
 0x89d   :  { %v4110_v9 = vpop.eup %4109 }
 0x89e   :  { %v4112_v10 = vpop.eup %4111  ;;  %v3042_v13 = vmul.f32 %v4110_v9, %v4108_v29 }
 0x89f   :  { %v3041_v12 = vmul.f32 %v4112_v10, %v4921_v15  ;;  %v4114_v36 = vpop.eup %4113  ;;  %v3984_v15 = vld [vmem:[%s5048_s8 + $0x18] sm:$0xff]  }
 0x8a1   :  { %v3043_v14 = vadd.f32 %v3042_v13, %v3041_v12 }
 0x8a3   :  { %4115 = vtanh.f32 %v3043_v14 }
 0x8ad   :  { %v4116_v37 = vpop.eup %4115 }
 0x8ae   :  { %v3045_v38 = vmul.f32 %v4116_v37, %v4114_v36 }
 0x8b0   :  { %3046 = vst [vmem:[#allocation2 + $0x7] sm:$0x1] %v3045_v38 }
 0x8b7   :  { %v3047_v39 = vld [vmem:[#allocation2] sm:$0xff] }
 0x8b8   :  { %v3048_v40 = vpack.c.bf16 %v3047_v39, %v3047_v39 }
 0x8ba   :  { %3774 = vmatmul.mubr.bf16.vlgmr.msra.gmra.mrb[36].mxu0 %v3048_v40 }
 0x8bb   :  { %3813 = vmatprep.mubr.msk.bf16.mxu0 %vm4120_vm0, %v4119_v33  ;;  %3798 = vmatpush3.bf16.msra.mxu0 %v3981_v43 }
 0x8bc   :  { %3799 = vmatprep.subr.bf16.mxu0 %v4119_v33 }
 0x8bf   :  { %3800 = vmatpush3.bf16.msra.mxu0 %v3982_v56 }
 0x8c0   :  { %3801 = vmatprep.subr.bf16.mxu0 %v4119_v33 }
 0x8c3   :  { %3802 = vmatpush3.bf16.msra.mxu0 %v3983_v4 }
 0x8c4   :  { %3803 = vmatprep.subr.bf16.mxu0 %v4119_v33 }
 0x8c7   :  { %3804 = vmatpush3.bf16.msra.mxu0 %v3984_v15 }
 0x8c8   :  { %3805 = vmatprep.subr.bf16.mxu0 %v4119_v33 }
 0x8cb   :  { %3806 = vmatpush3.bf16.msra.mxu0 %v3985_v17 }
 0x8cc   :  { %3807 = vmatprep.subr.bf16.mxu0 %v4119_v33 }
 0x8cf   :  { %3808 = vmatpush3.bf16.msra.mxu0 %v3986_v18 }
 0x8d0   :  { %3809 = vmatprep.subr.bf16.mxu0 %v4119_v33 }
 0x8d3   :  { %3810 = vmatpush3.bf16.msra.mxu0 %v3987_v50 }
 0x8d4   :  { %3811 = vmatprep.subr.bf16.mxu0 %v4119_v33  ;;  %v3721_v33 = vld [vmem:[%s5051_s9] ss:$0 sm:$0xff] }
 0x8d7   :  { %3812 = vmatpush3.bf16.msra.mxu0 %v3988_v51 }
 0x98d   :  { %v3154_v20 = vpop.f32.mrb[36].mxu0 }
 0x98e   :  { %v3155_v44 = vadd.f32 %v3703_v19, %v3154_v20  ;;  %v3775_v45 = vpop.f32.mrb[37].mxu0 }
 0x98f   :  { %v3157_v21 = vpop.f32.mrb[38].mxu0 }
 0x990   :  { %v3160_v46 = vmax.f32 %v3155_v44, 0.0  ;;  %v3776_v47 = vpop.f32.mrb[39].mxu0 }
 0x992   :  { %v3161_v49 = vpack.c.bf16 %v3160_v46, %v3160_v46 }
 0x994   :  { %3794 = vmatmul.mubr.bf16.vlgmr.msra.gmra.mrb[36].mxu1 %v3161_v49 }
 0xa67   :  { %v3267_v16 = vpop.f32.mrb[36].mxu1 }
 0xa68   :  { %v3268_v53 = vadd.f32 %v3712_v52, %v3267_v16  ;;  %v3795_v54 = vpop.f32.mrb[37].mxu1 }
 0xa69   :  { %v3270_v55 = vpop.f32.mrb[38].mxu1 }
 0xa6a   :  { %v3273_v57 = vmax.f32 %v3268_v53, 0.0  ;;  %v3796_v58 = vpop.f32.mrb[39].mxu1 }
 0xa6c   :  { %v3274_v59 = vpack.c.bf16 %v3273_v57, %v3273_v57 }
 0xa6e   :  { %3814 = vmatmul.mubr.bf16.vlgmr.msra.gmra.mrb[40].mxu0 %v3274_v59 }
 0xb41   :  { %v3380_v60 = vpop.f32.mrb[40].mxu0 }
 0xb42   :  { %v3381_v48 = vadd.f32 %v3721_v33, %v3380_v60  ;;  %v3815_v61 = vpop.f32.mrb[41].mxu0 }
 0xb43   :  { %v3383_v62 = vpop.f32.mrb[42].mxu0 }
 0xb44   :  { %3386 = vst [vmem:[%s5052_s10] sm:$0xff] %v3381_v48  ;;  %v3816_v63 = vpop.f32.mrb[43].mxu0 }

</bundles_post_ra>
